<compile_context>
chip_gen: v6e
topology: v6e:2x2x1
jax: 0.10.0
libtpu: 0.0.40
codegen_flags: <defaults>
</compile_context>

<pallas_src>
import math
import functools

import jax
import jax.numpy as jnp
from jax.experimental import pallas as pl
from jax.experimental.pallas import tpu as pltpu


_MM = dict(preferred_element_type=jnp.float32)


# --------------------------------------------------------------------------- #
# parameter init (deterministic, PyTorch-default-style uniform)
# --------------------------------------------------------------------------- #
def _uniform(key, shape, bound):
    return jax.random.uniform(key, shape, jnp.float32, -bound, bound)


def lstm_cell_params(key, din, hidden):
    """torch.nn.LSTMCell params, transposed: W_ih^T (D,4H), W_hh^T (H,4H), b (1,4H)."""
    k1, k2, k3, k4 = jax.random.split(key, 4)
    bound = 1.0 / math.sqrt(hidden)
    wih_t = _uniform(k1, (din, 4 * hidden), bound)
    whh_t = _uniform(k2, (hidden, 4 * hidden), bound)
    b = _uniform(k3, (1, 4 * hidden), bound) + _uniform(k4, (1, 4 * hidden), bound)
    return wih_t, whh_t, b


# --------------------------------------------------------------------------- #
# in-kernel LSTM gate math (gate order i, f, g, o); Hc = per-cell width
# --------------------------------------------------------------------------- #
def _sigmoid_via_tanh(x):
    # sigmoid(x) == 0.5 * tanh(0.5 * x) + 0.5  -> one EUP push instead of exp+recip
    return 0.5 * jnp.tanh(0.5 * x) + 0.5


def _lstm_gate_math(gates, c, Hc):
    """gates: (Bp, 4*Hc) laid out [i | f | g | o]; c: (Bp, Hc)."""
    i = _sigmoid_via_tanh(gates[:, 0 * Hc:1 * Hc])
    f = _sigmoid_via_tanh(gates[:, 1 * Hc:2 * Hc])
    g = jnp.tanh(gates[:, 2 * Hc:3 * Hc])
    o = _sigmoid_via_tanh(gates[:, 3 * Hc:4 * Hc])
    c_new = f * c + i * g
    h_new = o * jnp.tanh(c_new)
    return h_new, c_new


# --------------------------------------------------------------------------- #
# Kernel: unidirectional LSTM over the whole sequence (single invocation).
# x: (T*Bp, D), wih: (D, 4H), whh: (H, 4H), b: (1, 4H) -> out: (T*Bp, H)
# scratch: gx_ref (T*Bp, 4H)
# --------------------------------------------------------------------------- #
def _uni_lstm_kernel(x_ref, wih_ref, whh_ref, b_ref, out_ref, gx_ref, *, T, Bp, H):
    # hoisted input projection for all timesteps, bias folded in, staged in VMEM
    gx_ref[...] = jnp.dot(x_ref[...], wih_ref[...], **_MM) + b_ref[...]

    def step(t, carry):
        h, c = carry
        off = pl.multiple_of(t * Bp, Bp)
        gates = gx_ref[pl.ds(off, Bp), :] + jnp.dot(h, whh_ref[...], **_MM)
        h, c = _lstm_gate_math(gates, c, H)
        out_ref[pl.ds(off, Bp), :] = h
        return h, c

    h0 = jnp.zeros((Bp, H), jnp.float32)
    c0 = jnp.zeros((Bp, H), jnp.float32)
    jax.lax.fori_loop(0, T, step, (h0, c0), unroll=True)


# --------------------------------------------------------------------------- #
# Kernel: bidirectional LSTM, both directions fused (dir-major gate packing).
#   gate columns: [i_f f_f g_f o_f | i_b f_b g_b o_b]  (each dir 4H = 128 wide)
#   carried h = [h_f | h_b] (Bp, 2H); cell states c_f, c_b carried separately
# x: (T*Bp, D), wih: (D, 8H), whh: (2H, 8H) block-diag, b: (1, 8H)
# out: (T*Bp, 2H) = [forward hidden | backward hidden] per timestep
# scratch: gx_ref (T*Bp, 8H), hst_ref (T*Bp, 2H)
# --------------------------------------------------------------------------- #
def _bidir_lstm_kernel(x_ref, wih_ref, whh_ref, b_ref, out_ref, gx_ref, hst_ref,
                       *, T, Bp, H):
    G4 = 4 * H          # per-direction gate width (128 lanes for H=32)
    H2 = 2 * H
    # hoisted input projection for BOTH directions, bias folded in, staged in VMEM
    gx_ref[...] = jnp.dot(x_ref[...], wih_ref[...], **_MM) + b_ref[...]

    def step(t, carry):
        h, c_f, c_b = carry                               # h = [h_f | h_b]
        off_f = pl.multiple_of(t * Bp, Bp)                # forward time t
        off_b = pl.multiple_of((T - 1 - t) * Bp, Bp)      # backward time T-1-t
        # one fused (Bp,2H)x(2H,8H) recurrent matmul covers both directions
        rec = jnp.dot(h, whh_ref[...], **_MM)             # (Bp, 8H)
        # two static 128-lane-aligned gate-input slices (no jnp.where select)
        gates_f = gx_ref[pl.ds(off_f, Bp), 0:G4] + rec[:, 0:G4]
        gates_b = gx_ref[pl.ds(off_b, Bp), G4:2 * G4] + rec[:, G4:2 * G4]
        h_f, c_f = _lstm_gate_math(gates_f, c_f, H)
        h_b, c_b = _lstm_gate_math(gates_b, c_b, H)
        h = jnp.concatenate([h_f, h_b], axis=-1)
        # single contiguous store per step; time reordering happens post-loop
        hst_ref[pl.ds(off_f, Bp), :] = h
        return h, c_f, c_b

    h0 = jnp.zeros((Bp, H2), jnp.float32)
    c0 = jnp.zeros((Bp, H), jnp.float32)
    jax.lax.fori_loop(0, T, step, (h0, c0, c0), unroll=True)

    # Post-loop assembly (off the serial chain): forward half stays at time t,
    # backward half is time-reversed into place.  Static offsets, no carries.
    for t in range(T):
        tb = T - 1 - t
        out_ref[t * Bp:(t + 1) * Bp, :] = jnp.concatenate(
            [hst_ref[t * Bp:(t + 1) * Bp, 0:H],
             hst_ref[tb * Bp:(tb + 1) * Bp, H:H2]], axis=-1)


# --------------------------------------------------------------------------- #
# RNN module wrapper (mirrors the PyTorch module's 'batch' mode forward)
# --------------------------------------------------------------------------- #
class RNN:
    def __init__(self, input_dim, out_dim, cell_type='lstm', bi_dir=False, *, key):
        assert cell_type == 'lstm'  # TODO(synk): GRUCell branch not implemented
        self.input_dim = input_dim
        self.out_dim = out_dim
        self.cell_type = cell_type
        self.bi_dir = bi_dir
        self.mode = 'batch'  # TODO(synk): stateful 'step' mode not implemented
        self.hidden_dim = out_dim // 2 if bi_dir else out_dim
        H = self.hidden_dim

        kf, kb = jax.random.split(key)
        self.raw_f = lstm_cell_params(kf, input_dim, H)
        if bi_dir:
            self.raw_b = lstm_cell_params(kb, input_dim, H)
            wf_ih, wf_hh, bf = self.raw_f
            wb_ih, wb_hh, bb = self.raw_b
            # dir-major packing: columns [4H forward | 4H backward]; per-step
            # gate fetch in the kernel is two 128-lane-aligned static slices.
            self.wih = jnp.concatenate([wf_ih, wb_ih], axis=1)            # (D, 8H)
            z = jnp.zeros_like(wf_hh)
            self.whh = jnp.concatenate(
                [jnp.concatenate([wf_hh, z], axis=1),
                 jnp.concatenate([z, wb_hh], axis=1)], axis=0)            # (2H, 8H)
            self.b = jnp.concatenate([bf, bb], axis=1)                    # (1, 8H)
        else:
            self.wih, self.whh, self.b = self.raw_f

    def __call__(self, x):
        return self.forward(x)

    def forward(self, x):
        T, B, D = x.shape
        H = self.hidden_dim
        Bp = max(8, ((B + 7) // 8) * 8)             # pad batch to full sublanes
        # TODO(synk): when many independent sequences are evaluated (DLow does),
        # batch them here so Bp approaches the MXU row count and add a
        # "parallel" grid axis to use v7x's second TensorCore.
        x_pad = jnp.pad(x, ((0, 0), (0, Bp - B), (0, 0)))
        x2d = x_pad.reshape(T * Bp, D)              # 2-D, lane/sublane friendly

        if self.bi_dir:
            kern = functools.partial(_bidir_lstm_kernel, T=T, Bp=Bp, H=H)
            scratch = [pltpu.VMEM((T * Bp, 8 * H), jnp.float32),   # gx (both dirs)
                       pltpu.VMEM((T * Bp, 2 * H), jnp.float32)]   # h staging
        else:
            kern = functools.partial(_uni_lstm_kernel, T=T, Bp=Bp, H=H)
            scratch = [pltpu.VMEM((T * Bp, 4 * H), jnp.float32)]   # gx

        out2d = pl.pallas_call(
            kern,
            out_shape=jax.ShapeDtypeStruct((T * Bp, self.out_dim), jnp.float32),
            in_specs=[pl.BlockSpec(memory_space=pltpu.MemorySpace.VMEM)] * 4,
            out_specs=pl.BlockSpec(memory_space=pltpu.MemorySpace.VMEM),
            scratch_shapes=scratch,
        )(x2d, self.wih, self.whh, self.b)

        return out2d.reshape(T, Bp, self.out_dim)[:, :B, :]


# --------------------------------------------------------------------------- #
# Pure-JAX reference straight from the PyTorch batch_forward semantics
# --------------------------------------------------------------------------- #
def rnn_reference(x, rnn):
    H = rnn.hidden_dim

    def run(x_seq, params):
        wih, whh, b = params
        T, B, _ = x_seq.shape
        h = jnp.zeros((B, H), jnp.float32)
        c = jnp.zeros((B, H), jnp.float32)
        outs = []
        for t in range(T):
            gates = (jnp.dot(x_seq[t], wih, precision='highest')
                     + jnp.dot(h, whh, precision='highest') + b)
            i = jax.nn.sigmoid(gates[:, 0:H])
            f = jax.nn.sigmoid(gates[:, H:2 * H])
            g = jnp.tanh(gates[:, 2 * H:3 * H])
            o = jax.nn.sigmoid(gates[:, 3 * H:4 * H])
            c = f * c + i * g
            h = o * jnp.tanh(c)
            outs.append(h)
        return jnp.stack(outs, axis=0)

    out_f = run(x, rnn.raw_f)
    if not rnn.bi_dir:
        return out_f
    out_b = run(x[::-1], rnn.raw_b)[::-1]
    return jnp.concatenate([out_f, out_b], axis=2)


# --------------------------------------------------------------------------- #
if __name__ == "__main__":
    T, B = 8, 2
    input_dim, out_dim = 16, 64          # bi_dir -> hidden=32 per direction

    key = jax.random.PRNGKey(0)
    kp_bi, kp_uni, kx = jax.random.split(key, 3)
    x = jax.random.normal(kx, (T, B, input_dim), dtype=jnp.float32)

    # bidirectional (as used by DLow's encoders)
    rnn_bi = RNN(input_dim, out_dim, cell_type='lstm', bi_dir=True, key=kp_bi)
    out_bi = rnn_bi(x)
    # unidirectional (module default bi_dir=False)
    rnn_uni = RNN(input_dim, out_dim, cell_type='lstm', bi_dir=False, key=kp_uni)
    out_uni = rnn_uni(x)
    out_bi, out_uni = jax.block_until_ready((out_bi, out_uni))

    assert out_bi.shape == (T, B, out_dim)
    assert out_uni.shape == (T, B, out_dim)
    assert bool(jnp.all(jnp.isfinite(out_bi)))
    assert bool(jnp.all(jnp.isfinite(out_uni)))

    ref_bi = rnn_reference(x, rnn_bi)
    ref_uni = rnn_reference(x, rnn_uni)
    # tightened tolerance (was 2e-2); any packing/indexing bug gives O(0.1+)
    assert float(jnp.max(jnp.abs(out_bi - ref_bi))) < 5e-3
    assert float(jnp.max(jnp.abs(out_uni - ref_uni))) < 5e-3

    print("KERNEL_OK")
</pallas_src>

<mosaic_0001>
module attributes {stable_mosaic.version = 11 : i64} {
  func.func @_bidir_lstm_kernel(%arg0: memref<64x16xf32, #tpu.memory_space<vmem>>, %arg1: memref<16x256xf32, #tpu.memory_space<vmem>>, %arg2: memref<64x256xf32, #tpu.memory_space<vmem>>, %arg3: memref<1x256xf32, #tpu.memory_space<vmem>>, %arg4: memref<64x64xf32, #tpu.memory_space<vmem>>, %arg5: memref<64x256xf32, #tpu.memory_space<vmem>>, %arg6: memref<64x64xf32, #tpu.memory_space<vmem>>) attributes {dimension_semantics = [], scalar_prefetch = 0 : i64, scratch_operands = 2 : i64, tpu.core_type = #tpu.core_type<tc>} {
    %c0 = arith.constant 0 : index
    %c0_0 = arith.constant 0 : index
    %0 = vector.load %arg0[%c0, %c0_0] : memref<64x16xf32, #tpu.memory_space<vmem>>, vector<64x16xf32>
    %c0_1 = arith.constant 0 : index
    %c0_2 = arith.constant 0 : index
    %1 = vector.load %arg1[%c0_1, %c0_2] : memref<16x256xf32, #tpu.memory_space<vmem>>, vector<16x256xf32>
    %cst = arith.constant dense<0.000000e+00> : vector<64x256xf32>
    %2 = tpu.matmul %0, %1, %cst {dimension_numbers = #tpu.dot_dimension_numbers<[1], [0], [0], [1], [0, 0, 1, 1], [], []>} : vector<64x16xf32>, vector<16x256xf32>, vector<64x256xf32> -> vector<64x256xf32>
    %c0_3 = arith.constant 0 : index
    %c0_4 = arith.constant 0 : index
    %3 = vector.load %arg3[%c0_3, %c0_4] : memref<1x256xf32, #tpu.memory_space<vmem>>, vector<1x256xf32>
    %4 = vector.broadcast %3 : vector<1x256xf32> to vector<64x256xf32>
    %5 = arith.addf %2, %4 : vector<64x256xf32>
    %c0_5 = arith.constant 0 : index
    %c0_6 = arith.constant 0 : index
    %6 = vector.load %arg5[%c0_5, %c0_6] : memref<64x256xf32, #tpu.memory_space<vmem>>, vector<64x256xf32>
    tpu.vector_store %arg5[%c0_5, %c0_6], %5 {strides = array<i32>} : memref<64x256xf32, #tpu.memory_space<vmem>>, vector<64x256xf32>,
    %cst_7 = arith.constant 0.000000e+00 : f32
    %7 = vector.broadcast %cst_7 : f32 to vector<8x64xf32>
    %cst_8 = arith.constant 0.000000e+00 : f32
    %8 = vector.broadcast %cst_8 : f32 to vector<8x32xf32>
    %c0_i32 = arith.constant 0 : i32
    %c8_i32 = arith.constant 8 : i32
    %9 = arith.muli %c0_i32, %c8_i32 : i32
    %10 = tpu.assume_multiple %9, 8 : i32
    %c7_i32 = arith.constant 7 : i32
    %11 = arith.subi %c7_i32, %c0_i32 : i32
    %c8_i32_9 = arith.constant 8 : i32
    %12 = arith.muli %11, %c8_i32_9 : i32
    %13 = tpu.assume_multiple %12, 8 : i32
    %c0_10 = arith.constant 0 : index
    %c0_11 = arith.constant 0 : index
    %14 = vector.load %arg2[%c0_10, %c0_11] : memref<64x256xf32, #tpu.memory_space<vmem>>, vector<64x256xf32>
    %cst_12 = arith.constant dense<0.000000e+00> : vector<8x256xf32>
    %15 = tpu.matmul %7, %14, %cst_12 {dimension_numbers = #tpu.dot_dimension_numbers<[1], [0], [0], [1], [0, 0, 1, 1], [], []>} : vector<8x64xf32>, vector<64x256xf32>, vector<8x256xf32> -> vector<8x256xf32>
    %16 = arith.index_cast %10 : i32 to index
    %c0_13 = arith.constant 0 : index
    %17 = vector.load %arg5[%16, %c0_13] : memref<64x256xf32, #tpu.memory_space<vmem>>, vector<8x128xf32>
    %18 = vector.extract_strided_slice %15 {offsets = [0, 0], sizes = [8, 128], strides = [1, 1]} : vector<8x256xf32> to vector<8x128xf32>
    %19 = arith.addf %17, %18 : vector<8x128xf32>
    %20 = arith.index_cast %13 : i32 to index
    %c128 = arith.constant 128 : index
    %21 = vector.load %arg5[%20, %c128] : memref<64x256xf32, #tpu.memory_space<vmem>>, vector<8x128xf32>
    %22 = vector.extract_strided_slice %15 {offsets = [0, 128], sizes = [8, 128], strides = [1, 1]} : vector<8x256xf32> to vector<8x128xf32>
    %23 = arith.addf %21, %22 : vector<8x128xf32>
    %24 = vector.extract_strided_slice %19 {offsets = [0, 0], sizes = [8, 32], strides = [1, 1]} : vector<8x128xf32> to vector<8x32xf32>
    %cst_14 = arith.constant 5.000000e-01 : f32
    %25 = vector.broadcast %cst_14 : f32 to vector<8x32xf32>
    %26 = arith.mulf %25, %24 : vector<8x32xf32>
    %27 = math.tanh %26 : vector<8x32xf32>
    %cst_15 = arith.constant 5.000000e-01 : f32
    %28 = vector.broadcast %cst_15 : f32 to vector<8x32xf32>
    %29 = arith.mulf %28, %27 : vector<8x32xf32>
    %cst_16 = arith.constant 5.000000e-01 : f32
    %30 = vector.broadcast %cst_16 : f32 to vector<8x32xf32>
    %31 = arith.addf %29, %30 : vector<8x32xf32>
    %32 = vector.extract_strided_slice %19 {offsets = [0, 32], sizes = [8, 32], strides = [1, 1]} : vector<8x128xf32> to vector<8x32xf32>
    %cst_17 = arith.constant 5.000000e-01 : f32
    %33 = vector.broadcast %cst_17 : f32 to vector<8x32xf32>
    %34 = arith.mulf %33, %32 : vector<8x32xf32>
    %35 = math.tanh %34 : vector<8x32xf32>
    %cst_18 = arith.constant 5.000000e-01 : f32
    %36 = vector.broadcast %cst_18 : f32 to vector<8x32xf32>
    %37 = arith.mulf %36, %35 : vector<8x32xf32>
    %cst_19 = arith.constant 5.000000e-01 : f32
    %38 = vector.broadcast %cst_19 : f32 to vector<8x32xf32>
    %39 = arith.addf %37, %38 : vector<8x32xf32>
    %40 = vector.extract_strided_slice %19 {offsets = [0, 64], sizes = [8, 32], strides = [1, 1]} : vector<8x128xf32> to vector<8x32xf32>
    %41 = math.tanh %40 : vector<8x32xf32>
    %42 = vector.extract_strided_slice %19 {offsets = [0, 96], sizes = [8, 32], strides = [1, 1]} : vector<8x128xf32> to vector<8x32xf32>
    %cst_20 = arith.constant 5.000000e-01 : f32
    %43 = vector.broadcast %cst_20 : f32 to vector<8x32xf32>
    %44 = arith.mulf %43, %42 : vector<8x32xf32>
    %45 = math.tanh %44 : vector<8x32xf32>
    %cst_21 = arith.constant 5.000000e-01 : f32
    %46 = vector.broadcast %cst_21 : f32 to vector<8x32xf32>
    %47 = arith.mulf %46, %45 : vector<8x32xf32>
    %cst_22 = arith.constant 5.000000e-01 : f32
    %48 = vector.broadcast %cst_22 : f32 to vector<8x32xf32>
    %49 = arith.addf %47, %48 : vector<8x32xf32>
    %50 = arith.mulf %39, %8 : vector<8x32xf32>
    %51 = arith.mulf %31, %41 : vector<8x32xf32>
    %52 = arith.addf %50, %51 : vector<8x32xf32>
    %53 = math.tanh %52 : vector<8x32xf32>
    %54 = arith.mulf %49, %53 : vector<8x32xf32>
    %55 = vector.extract_strided_slice %23 {offsets = [0, 0], sizes = [8, 32], strides = [1, 1]} : vector<8x128xf32> to vector<8x32xf32>
    %cst_23 = arith.constant 5.000000e-01 : f32
    %56 = vector.broadcast %cst_23 : f32 to vector<8x32xf32>
    %57 = arith.mulf %56, %55 : vector<8x32xf32>
    %58 = math.tanh %57 : vector<8x32xf32>
    %cst_24 = arith.constant 5.000000e-01 : f32
    %59 = vector.broadcast %cst_24 : f32 to vector<8x32xf32>
    %60 = arith.mulf %59, %58 : vector<8x32xf32>
    %cst_25 = arith.constant 5.000000e-01 : f32
    %61 = vector.broadcast %cst_25 : f32 to vector<8x32xf32>
    %62 = arith.addf %60, %61 : vector<8x32xf32>
    %63 = vector.extract_strided_slice %23 {offsets = [0, 32], sizes = [8, 32], strides = [1, 1]} : vector<8x128xf32> to vector<8x32xf32>
    %cst_26 = arith.constant 5.000000e-01 : f32
    %64 = vector.broadcast %cst_26 : f32 to vector<8x32xf32>
    %65 = arith.mulf %64, %63 : vector<8x32xf32>
    %66 = math.tanh %65 : vector<8x32xf32>
    %cst_27 = arith.constant 5.000000e-01 : f32
    %67 = vector.broadcast %cst_27 : f32 to vector<8x32xf32>
    %68 = arith.mulf %67, %66 : vector<8x32xf32>
    %cst_28 = arith.constant 5.000000e-01 : f32
    %69 = vector.broadcast %cst_28 : f32 to vector<8x32xf32>
    %70 = arith.addf %68, %69 : vector<8x32xf32>
    %71 = vector.extract_strided_slice %23 {offsets = [0, 64], sizes = [8, 32], strides = [1, 1]} : vector<8x128xf32> to vector<8x32xf32>
    %72 = math.tanh %71 : vector<8x32xf32>
    %73 = vector.extract_strided_slice %23 {offsets = [0, 96], sizes = [8, 32], strides = [1, 1]} : vector<8x128xf32> to vector<8x32xf32>
    %cst_29 = arith.constant 5.000000e-01 : f32
    %74 = vector.broadcast %cst_29 : f32 to vector<8x32xf32>
    %75 = arith.mulf %74, %73 : vector<8x32xf32>
    %76 = math.tanh %75 : vector<8x32xf32>
    %cst_30 = arith.constant 5.000000e-01 : f32
    %77 = vector.broadcast %cst_30 : f32 to vector<8x32xf32>
    %78 = arith.mulf %77, %76 : vector<8x32xf32>
    %cst_31 = arith.constant 5.000000e-01 : f32
    %79 = vector.broadcast %cst_31 : f32 to vector<8x32xf32>
    %80 = arith.addf %78, %79 : vector<8x32xf32>
    %81 = arith.mulf %70, %8 : vector<8x32xf32>
    %82 = arith.mulf %62, %72 : vector<8x32xf32>
    %83 = arith.addf %81, %82 : vector<8x32xf32>
    %84 = math.tanh %83 : vector<8x32xf32>
    %85 = arith.mulf %80, %84 : vector<8x32xf32>
    %86 = tpu.concatenate %54, %85 in 1 : vector<8x32xf32>, vector<8x32xf32> -> vector<8x64xf32>
    %87 = arith.index_cast %10 : i32 to index
    %c0_32 = arith.constant 0 : index
    %88 = vector.load %arg6[%87, %c0_32] : memref<64x64xf32, #tpu.memory_space<vmem>>, vector<8x64xf32>
    tpu.vector_store %arg6[%87, %c0_32], %86 {strides = array<i32>} : memref<64x64xf32, #tpu.memory_space<vmem>>, vector<8x64xf32>,
    %c1_i32 = arith.constant 1 : i32
    %c8_i32_33 = arith.constant 8 : i32
    %89 = arith.muli %c1_i32, %c8_i32_33 : i32
    %90 = tpu.assume_multiple %89, 8 : i32
    %c7_i32_34 = arith.constant 7 : i32
    %91 = arith.subi %c7_i32_34, %c1_i32 : i32
    %c8_i32_35 = arith.constant 8 : i32
    %92 = arith.muli %91, %c8_i32_35 : i32
    %93 = tpu.assume_multiple %92, 8 : i32
    %c0_36 = arith.constant 0 : index
    %c0_37 = arith.constant 0 : index
    %94 = vector.load %arg2[%c0_36, %c0_37] : memref<64x256xf32, #tpu.memory_space<vmem>>, vector<64x256xf32>
    %cst_38 = arith.constant dense<0.000000e+00> : vector<8x256xf32>
    %95 = tpu.matmul %86, %94, %cst_38 {dimension_numbers = #tpu.dot_dimension_numbers<[1], [0], [0], [1], [0, 0, 1, 1], [], []>} : vector<8x64xf32>, vector<64x256xf32>, vector<8x256xf32> -> vector<8x256xf32>
    %96 = arith.index_cast %90 : i32 to index
    %c0_39 = arith.constant 0 : index
    %97 = vector.load %arg5[%96, %c0_39] : memref<64x256xf32, #tpu.memory_space<vmem>>, vector<8x128xf32>
    %98 = vector.extract_strided_slice %95 {offsets = [0, 0], sizes = [8, 128], strides = [1, 1]} : vector<8x256xf32> to vector<8x128xf32>
    %99 = arith.addf %97, %98 : vector<8x128xf32>
    %100 = arith.index_cast %93 : i32 to index
    %c128_40 = arith.constant 128 : index
    %101 = vector.load %arg5[%100, %c128_40] : memref<64x256xf32, #tpu.memory_space<vmem>>, vector<8x128xf32>
    %102 = vector.extract_strided_slice %95 {offsets = [0, 128], sizes = [8, 128], strides = [1, 1]} : vector<8x256xf32> to vector<8x128xf32>
    %103 = arith.addf %101, %102 : vector<8x128xf32>
    %104 = vector.extract_strided_slice %99 {offsets = [0, 0], sizes = [8, 32], strides = [1, 1]} : vector<8x128xf32> to vector<8x32xf32>
    %cst_41 = arith.constant 5.000000e-01 : f32
    %105 = vector.broadcast %cst_41 : f32 to vector<8x32xf32>
    %106 = arith.mulf %105, %104 : vector<8x32xf32>
    %107 = math.tanh %106 : vector<8x32xf32>
    %cst_42 = arith.constant 5.000000e-01 : f32
    %108 = vector.broadcast %cst_42 : f32 to vector<8x32xf32>
    %109 = arith.mulf %108, %107 : vector<8x32xf32>
    %cst_43 = arith.constant 5.000000e-01 : f32
    %110 = vector.broadcast %cst_43 : f32 to vector<8x32xf32>
    %111 = arith.addf %109, %110 : vector<8x32xf32>
    %112 = vector.extract_strided_slice %99 {offsets = [0, 32], sizes = [8, 32], strides = [1, 1]} : vector<8x128xf32> to vector<8x32xf32>
    %cst_44 = arith.constant 5.000000e-01 : f32
    %113 = vector.broadcast %cst_44 : f32 to vector<8x32xf32>
    %114 = arith.mulf %113, %112 : vector<8x32xf32>
    %115 = math.tanh %114 : vector<8x32xf32>
    %cst_45 = arith.constant 5.000000e-01 : f32
    %116 = vector.broadcast %cst_45 : f32 to vector<8x32xf32>
    %117 = arith.mulf %116, %115 : vector<8x32xf32>
    %cst_46 = arith.constant 5.000000e-01 : f32
    %118 = vector.broadcast %cst_46 : f32 to vector<8x32xf32>
    %119 = arith.addf %117, %118 : vector<8x32xf32>
    %120 = vector.extract_strided_slice %99 {offsets = [0, 64], sizes = [8, 32], strides = [1, 1]} : vector<8x128xf32> to vector<8x32xf32>
    %121 = math.tanh %120 : vector<8x32xf32>
    %122 = vector.extract_strided_slice %99 {offsets = [0, 96], sizes = [8, 32], strides = [1, 1]} : vector<8x128xf32> to vector<8x32xf32>
    %cst_47 = arith.constant 5.000000e-01 : f32
    %123 = vector.broadcast %cst_47 : f32 to vector<8x32xf32>
    %124 = arith.mulf %123, %122 : vector<8x32xf32>
    %125 = math.tanh %124 : vector<8x32xf32>
    %cst_48 = arith.constant 5.000000e-01 : f32
    %126 = vector.broadcast %cst_48 : f32 to vector<8x32xf32>
    %127 = arith.mulf %126, %125 : vector<8x32xf32>
    %cst_49 = arith.constant 5.000000e-01 : f32
    %128 = vector.broadcast %cst_49 : f32 to vector<8x32xf32>
    %129 = arith.addf %127, %128 : vector<8x32xf32>
    %130 = arith.mulf %119, %52 : vector<8x32xf32>
    %131 = arith.mulf %111, %121 : vector<8x32xf32>
    %132 = arith.addf %130, %131 : vector<8x32xf32>
    %133 = math.tanh %132 : vector<8x32xf32>
    %134 = arith.mulf %129, %133 : vector<8x32xf32>
    %135 = vector.extract_strided_slice %103 {offsets = [0, 0], sizes = [8, 32], strides = [1, 1]} : vector<8x128xf32> to vector<8x32xf32>
    %cst_50 = arith.constant 5.000000e-01 : f32
    %136 = vector.broadcast %cst_50 : f32 to vector<8x32xf32>
    %137 = arith.mulf %136, %135 : vector<8x32xf32>
    %138 = math.tanh %137 : vector<8x32xf32>
    %cst_51 = arith.constant 5.000000e-01 : f32
    %139 = vector.broadcast %cst_51 : f32 to vector<8x32xf32>
    %140 = arith.mulf %139, %138 : vector<8x32xf32>
    %cst_52 = arith.constant 5.000000e-01 : f32
    %141 = vector.broadcast %cst_52 : f32 to vector<8x32xf32>
    %142 = arith.addf %140, %141 : vector<8x32xf32>
    %143 = vector.extract_strided_slice %103 {offsets = [0, 32], sizes = [8, 32], strides = [1, 1]} : vector<8x128xf32> to vector<8x32xf32>
    %cst_53 = arith.constant 5.000000e-01 : f32
    %144 = vector.broadcast %cst_53 : f32 to vector<8x32xf32>
    %145 = arith.mulf %144, %143 : vector<8x32xf32>
    %146 = math.tanh %145 : vector<8x32xf32>
    %cst_54 = arith.constant 5.000000e-01 : f32
    %147 = vector.broadcast %cst_54 : f32 to vector<8x32xf32>
    %148 = arith.mulf %147, %146 : vector<8x32xf32>
    %cst_55 = arith.constant 5.000000e-01 : f32
    %149 = vector.broadcast %cst_55 : f32 to vector<8x32xf32>
    %150 = arith.addf %148, %149 : vector<8x32xf32>
    %151 = vector.extract_strided_slice %103 {offsets = [0, 64], sizes = [8, 32], strides = [1, 1]} : vector<8x128xf32> to vector<8x32xf32>
    %152 = math.tanh %151 : vector<8x32xf32>
    %153 = vector.extract_strided_slice %103 {offsets = [0, 96], sizes = [8, 32], strides = [1, 1]} : vector<8x128xf32> to vector<8x32xf32>
    %cst_56 = arith.constant 5.000000e-01 : f32
    %154 = vector.broadcast %cst_56 : f32 to vector<8x32xf32>
    %155 = arith.mulf %154, %153 : vector<8x32xf32>
    %156 = math.tanh %155 : vector<8x32xf32>
    %cst_57 = arith.constant 5.000000e-01 : f32
    %157 = vector.broadcast %cst_57 : f32 to vector<8x32xf32>
    %158 = arith.mulf %157, %156 : vector<8x32xf32>
    %cst_58 = arith.constant 5.000000e-01 : f32
    %159 = vector.broadcast %cst_58 : f32 to vector<8x32xf32>
    %160 = arith.addf %158, %159 : vector<8x32xf32>
    %161 = arith.mulf %150, %83 : vector<8x32xf32>
    %162 = arith.mulf %142, %152 : vector<8x32xf32>
    %163 = arith.addf %161, %162 : vector<8x32xf32>
    %164 = math.tanh %163 : vector<8x32xf32>
    %165 = arith.mulf %160, %164 : vector<8x32xf32>
    %166 = tpu.concatenate %134, %165 in 1 : vector<8x32xf32>, vector<8x32xf32> -> vector<8x64xf32>
    %167 = arith.index_cast %90 : i32 to index
    %c0_59 = arith.constant 0 : index
    %168 = vector.load %arg6[%167, %c0_59] : memref<64x64xf32, #tpu.memory_space<vmem>>, vector<8x64xf32>
    tpu.vector_store %arg6[%167, %c0_59], %166 {strides = array<i32>} : memref<64x64xf32, #tpu.memory_space<vmem>>, vector<8x64xf32>,
    %c2_i32 = arith.constant 2 : i32
    %c8_i32_60 = arith.constant 8 : i32
    %169 = arith.muli %c2_i32, %c8_i32_60 : i32
    %170 = tpu.assume_multiple %169, 8 : i32
    %c7_i32_61 = arith.constant 7 : i32
    %171 = arith.subi %c7_i32_61, %c2_i32 : i32
    %c8_i32_62 = arith.constant 8 : i32
    %172 = arith.muli %171, %c8_i32_62 : i32
    %173 = tpu.assume_multiple %172, 8 : i32
    %c0_63 = arith.constant 0 : index
    %c0_64 = arith.constant 0 : index
    %174 = vector.load %arg2[%c0_63, %c0_64] : memref<64x256xf32, #tpu.memory_space<vmem>>, vector<64x256xf32>
    %cst_65 = arith.constant dense<0.000000e+00> : vector<8x256xf32>
    %175 = tpu.matmul %166, %174, %cst_65 {dimension_numbers = #tpu.dot_dimension_numbers<[1], [0], [0], [1], [0, 0, 1, 1], [], []>} : vector<8x64xf32>, vector<64x256xf32>, vector<8x256xf32> -> vector<8x256xf32>
    %176 = arith.index_cast %170 : i32 to index
    %c0_66 = arith.constant 0 : index
    %177 = vector.load %arg5[%176, %c0_66] : memref<64x256xf32, #tpu.memory_space<vmem>>, vector<8x128xf32>
    %178 = vector.extract_strided_slice %175 {offsets = [0, 0], sizes = [8, 128], strides = [1, 1]} : vector<8x256xf32> to vector<8x128xf32>
    %179 = arith.addf %177, %178 : vector<8x128xf32>
    %180 = arith.index_cast %173 : i32 to index
    %c128_67 = arith.constant 128 : index
    %181 = vector.load %arg5[%180, %c128_67] : memref<64x256xf32, #tpu.memory_space<vmem>>, vector<8x128xf32>
    %182 = vector.extract_strided_slice %175 {offsets = [0, 128], sizes = [8, 128], strides = [1, 1]} : vector<8x256xf32> to vector<8x128xf32>
    %183 = arith.addf %181, %182 : vector<8x128xf32>
    %184 = vector.extract_strided_slice %179 {offsets = [0, 0], sizes = [8, 32], strides = [1, 1]} : vector<8x128xf32> to vector<8x32xf32>
    %cst_68 = arith.constant 5.000000e-01 : f32
    %185 = vector.broadcast %cst_68 : f32 to vector<8x32xf32>
    %186 = arith.mulf %185, %184 : vector<8x32xf32>
    %187 = math.tanh %186 : vector<8x32xf32>
    %cst_69 = arith.constant 5.000000e-01 : f32
    %188 = vector.broadcast %cst_69 : f32 to vector<8x32xf32>
    %189 = arith.mulf %188, %187 : vector<8x32xf32>
    %cst_70 = arith.constant 5.000000e-01 : f32
    %190 = vector.broadcast %cst_70 : f32 to vector<8x32xf32>
    %191 = arith.addf %189, %190 : vector<8x32xf32>
    %192 = vector.extract_strided_slice %179 {offsets = [0, 32], sizes = [8, 32], strides = [1, 1]} : vector<8x128xf32> to vector<8x32xf32>
    %cst_71 = arith.constant 5.000000e-01 : f32
    %193 = vector.broadcast %cst_71 : f32 to vector<8x32xf32>
    %194 = arith.mulf %193, %192 : vector<8x32xf32>
    %195 = math.tanh %194 : vector<8x32xf32>
    %cst_72 = arith.constant 5.000000e-01 : f32
    %196 = vector.broadcast %cst_72 : f32 to vector<8x32xf32>
    %197 = arith.mulf %196, %195 : vector<8x32xf32>
    %cst_73 = arith.constant 5.000000e-01 : f32
    %198 = vector.broadcast %cst_73 : f32 to vector<8x32xf32>
    %199 = arith.addf %197, %198 : vector<8x32xf32>
    %200 = vector.extract_strided_slice %179 {offsets = [0, 64], sizes = [8, 32], strides = [1, 1]} : vector<8x128xf32> to vector<8x32xf32>
    %201 = math.tanh %200 : vector<8x32xf32>
    %202 = vector.extract_strided_slice %179 {offsets = [0, 96], sizes = [8, 32], strides = [1, 1]} : vector<8x128xf32> to vector<8x32xf32>
    %cst_74 = arith.constant 5.000000e-01 : f32
    %203 = vector.broadcast %cst_74 : f32 to vector<8x32xf32>
    %204 = arith.mulf %203, %202 : vector<8x32xf32>
    %205 = math.tanh %204 : vector<8x32xf32>
    %cst_75 = arith.constant 5.000000e-01 : f32
    %206 = vector.broadcast %cst_75 : f32 to vector<8x32xf32>
    %207 = arith.mulf %206, %205 : vector<8x32xf32>
    %cst_76 = arith.constant 5.000000e-01 : f32
    %208 = vector.broadcast %cst_76 : f32 to vector<8x32xf32>
    %209 = arith.addf %207, %208 : vector<8x32xf32>
    %210 = arith.mulf %199, %132 : vector<8x32xf32>
    %211 = arith.mulf %191, %201 : vector<8x32xf32>
    %212 = arith.addf %210, %211 : vector<8x32xf32>
    %213 = math.tanh %212 : vector<8x32xf32>
    %214 = arith.mulf %209, %213 : vector<8x32xf32>
    %215 = vector.extract_strided_slice %183 {offsets = [0, 0], sizes = [8, 32], strides = [1, 1]} : vector<8x128xf32> to vector<8x32xf32>
    %cst_77 = arith.constant 5.000000e-01 : f32
    %216 = vector.broadcast %cst_77 : f32 to vector<8x32xf32>
    %217 = arith.mulf %216, %215 : vector<8x32xf32>
    %218 = math.tanh %217 : vector<8x32xf32>
    %cst_78 = arith.constant 5.000000e-01 : f32
    %219 = vector.broadcast %cst_78 : f32 to vector<8x32xf32>
    %220 = arith.mulf %219, %218 : vector<8x32xf32>
    %cst_79 = arith.constant 5.000000e-01 : f32
    %221 = vector.broadcast %cst_79 : f32 to vector<8x32xf32>
    %222 = arith.addf %220, %221 : vector<8x32xf32>
    %223 = vector.extract_strided_slice %183 {offsets = [0, 32], sizes = [8, 32], strides = [1, 1]} : vector<8x128xf32> to vector<8x32xf32>
    %cst_80 = arith.constant 5.000000e-01 : f32
    %224 = vector.broadcast %cst_80 : f32 to vector<8x32xf32>
    %225 = arith.mulf %224, %223 : vector<8x32xf32>
    %226 = math.tanh %225 : vector<8x32xf32>
    %cst_81 = arith.constant 5.000000e-01 : f32
    %227 = vector.broadcast %cst_81 : f32 to vector<8x32xf32>
    %228 = arith.mulf %227, %226 : vector<8x32xf32>
    %cst_82 = arith.constant 5.000000e-01 : f32
    %229 = vector.broadcast %cst_82 : f32 to vector<8x32xf32>
    %230 = arith.addf %228, %229 : vector<8x32xf32>
    %231 = vector.extract_strided_slice %183 {offsets = [0, 64], sizes = [8, 32], strides = [1, 1]} : vector<8x128xf32> to vector<8x32xf32>
    %232 = math.tanh %231 : vector<8x32xf32>
    %233 = vector.extract_strided_slice %183 {offsets = [0, 96], sizes = [8, 32], strides = [1, 1]} : vector<8x128xf32> to vector<8x32xf32>
    %cst_83 = arith.constant 5.000000e-01 : f32
    %234 = vector.broadcast %cst_83 : f32 to vector<8x32xf32>
    %235 = arith.mulf %234, %233 : vector<8x32xf32>
    %236 = math.tanh %235 : vector<8x32xf32>
    %cst_84 = arith.constant 5.000000e-01 : f32
    %237 = vector.broadcast %cst_84 : f32 to vector<8x32xf32>
    %238 = arith.mulf %237, %236 : vector<8x32xf32>
    %cst_85 = arith.constant 5.000000e-01 : f32
    %239 = vector.broadcast %cst_85 : f32 to vector<8x32xf32>
    %240 = arith.addf %238, %239 : vector<8x32xf32>
    %241 = arith.mulf %230, %163 : vector<8x32xf32>
    %242 = arith.mulf %222, %232 : vector<8x32xf32>
    %243 = arith.addf %241, %242 : vector<8x32xf32>
    %244 = math.tanh %243 : vector<8x32xf32>
    %245 = arith.mulf %240, %244 : vector<8x32xf32>
    %246 = tpu.concatenate %214, %245 in 1 : vector<8x32xf32>, vector<8x32xf32> -> vector<8x64xf32>
    %247 = arith.index_cast %170 : i32 to index
    %c0_86 = arith.constant 0 : index
    %248 = vector.load %arg6[%247, %c0_86] : memref<64x64xf32, #tpu.memory_space<vmem>>, vector<8x64xf32>
    tpu.vector_store %arg6[%247, %c0_86], %246 {strides = array<i32>} : memref<64x64xf32, #tpu.memory_space<vmem>>, vector<8x64xf32>,
    %c3_i32 = arith.constant 3 : i32
    %c8_i32_87 = arith.constant 8 : i32
    %249 = arith.muli %c3_i32, %c8_i32_87 : i32
    %250 = tpu.assume_multiple %249, 8 : i32
    %c7_i32_88 = arith.constant 7 : i32
    %251 = arith.subi %c7_i32_88, %c3_i32 : i32
    %c8_i32_89 = arith.constant 8 : i32
    %252 = arith.muli %251, %c8_i32_89 : i32
    %253 = tpu.assume_multiple %252, 8 : i32
    %c0_90 = arith.constant 0 : index
    %c0_91 = arith.constant 0 : index
    %254 = vector.load %arg2[%c0_90, %c0_91] : memref<64x256xf32, #tpu.memory_space<vmem>>, vector<64x256xf32>
    %cst_92 = arith.constant dense<0.000000e+00> : vector<8x256xf32>
    %255 = tpu.matmul %246, %254, %cst_92 {dimension_numbers = #tpu.dot_dimension_numbers<[1], [0], [0], [1], [0, 0, 1, 1], [], []>} : vector<8x64xf32>, vector<64x256xf32>, vector<8x256xf32> -> vector<8x256xf32>
    %256 = arith.index_cast %250 : i32 to index
    %c0_93 = arith.constant 0 : index
    %257 = vector.load %arg5[%256, %c0_93] : memref<64x256xf32, #tpu.memory_space<vmem>>, vector<8x128xf32>
    %258 = vector.extract_strided_slice %255 {offsets = [0, 0], sizes = [8, 128], strides = [1, 1]} : vector<8x256xf32> to vector<8x128xf32>
    %259 = arith.addf %257, %258 : vector<8x128xf32>
    %260 = arith.index_cast %253 : i32 to index
    %c128_94 = arith.constant 128 : index
    %261 = vector.load %arg5[%260, %c128_94] : memref<64x256xf32, #tpu.memory_space<vmem>>, vector<8x128xf32>
    %262 = vector.extract_strided_slice %255 {offsets = [0, 128], sizes = [8, 128], strides = [1, 1]} : vector<8x256xf32> to vector<8x128xf32>
    %263 = arith.addf %261, %262 : vector<8x128xf32>
    %264 = vector.extract_strided_slice %259 {offsets = [0, 0], sizes = [8, 32], strides = [1, 1]} : vector<8x128xf32> to vector<8x32xf32>
    %cst_95 = arith.constant 5.000000e-01 : f32
    %265 = vector.broadcast %cst_95 : f32 to vector<8x32xf32>
    %266 = arith.mulf %265, %264 : vector<8x32xf32>
    %267 = math.tanh %266 : vector<8x32xf32>
    %cst_96 = arith.constant 5.000000e-01 : f32
    %268 = vector.broadcast %cst_96 : f32 to vector<8x32xf32>
    %269 = arith.mulf %268, %267 : vector<8x32xf32>
    %cst_97 = arith.constant 5.000000e-01 : f32
    %270 = vector.broadcast %cst_97 : f32 to vector<8x32xf32>
    %271 = arith.addf %269, %270 : vector<8x32xf32>
    %272 = vector.extract_strided_slice %259 {offsets = [0, 32], sizes = [8, 32], strides = [1, 1]} : vector<8x128xf32> to vector<8x32xf32>
    %cst_98 = arith.constant 5.000000e-01 : f32
    %273 = vector.broadcast %cst_98 : f32 to vector<8x32xf32>
    %274 = arith.mulf %273, %272 : vector<8x32xf32>
    %275 = math.tanh %274 : vector<8x32xf32>
    %cst_99 = arith.constant 5.000000e-01 : f32
    %276 = vector.broadcast %cst_99 : f32 to vector<8x32xf32>
    %277 = arith.mulf %276, %275 : vector<8x32xf32>
    %cst_100 = arith.constant 5.000000e-01 : f32
    %278 = vector.broadcast %cst_100 : f32 to vector<8x32xf32>
    %279 = arith.addf %277, %278 : vector<8x32xf32>
    %280 = vector.extract_strided_slice %259 {offsets = [0, 64], sizes = [8, 32], strides = [1, 1]} : vector<8x128xf32> to vector<8x32xf32>
    %281 = math.tanh %280 : vector<8x32xf32>
    %282 = vector.extract_strided_slice %259 {offsets = [0, 96], sizes = [8, 32], strides = [1, 1]} : vector<8x128xf32> to vector<8x32xf32>
    %cst_101 = arith.constant 5.000000e-01 : f32
    %283 = vector.broadcast %cst_101 : f32 to vector<8x32xf32>
    %284 = arith.mulf %283, %282 : vector<8x32xf32>
    %285 = math.tanh %284 : vector<8x32xf32>
    %cst_102 = arith.constant 5.000000e-01 : f32
    %286 = vector.broadcast %cst_102 : f32 to vector<8x32xf32>
    %287 = arith.mulf %286, %285 : vector<8x32xf32>
    %cst_103 = arith.constant 5.000000e-01 : f32
    %288 = vector.broadcast %cst_103 : f32 to vector<8x32xf32>
    %289 = arith.addf %287, %288 : vector<8x32xf32>
    %290 = arith.mulf %279, %212 : vector<8x32xf32>
    %291 = arith.mulf %271, %281 : vector<8x32xf32>
    %292 = arith.addf %290, %291 : vector<8x32xf32>
    %293 = math.tanh %292 : vector<8x32xf32>
    %294 = arith.mulf %289, %293 : vector<8x32xf32>
    %295 = vector.extract_strided_slice %263 {offsets = [0, 0], sizes = [8, 32], strides = [1, 1]} : vector<8x128xf32> to vector<8x32xf32>
    %cst_104 = arith.constant 5.000000e-01 : f32
    %296 = vector.broadcast %cst_104 : f32 to vector<8x32xf32>
    %297 = arith.mulf %296, %295 : vector<8x32xf32>
    %298 = math.tanh %297 : vector<8x32xf32>
    %cst_105 = arith.constant 5.000000e-01 : f32
    %299 = vector.broadcast %cst_105 : f32 to vector<8x32xf32>
    %300 = arith.mulf %299, %298 : vector<8x32xf32>
    %cst_106 = arith.constant 5.000000e-01 : f32
    %301 = vector.broadcast %cst_106 : f32 to vector<8x32xf32>
    %302 = arith.addf %300, %301 : vector<8x32xf32>
    %303 = vector.extract_strided_slice %263 {offsets = [0, 32], sizes = [8, 32], strides = [1, 1]} : vector<8x128xf32> to vector<8x32xf32>
    %cst_107 = arith.constant 5.000000e-01 : f32
    %304 = vector.broadcast %cst_107 : f32 to vector<8x32xf32>
    %305 = arith.mulf %304, %303 : vector<8x32xf32>
    %306 = math.tanh %305 : vector<8x32xf32>
    %cst_108 = arith.constant 5.000000e-01 : f32
    %307 = vector.broadcast %cst_108 : f32 to vector<8x32xf32>
    %308 = arith.mulf %307, %306 : vector<8x32xf32>
    %cst_109 = arith.constant 5.000000e-01 : f32
    %309 = vector.broadcast %cst_109 : f32 to vector<8x32xf32>
    %310 = arith.addf %308, %309 : vector<8x32xf32>
    %311 = vector.extract_strided_slice %263 {offsets = [0, 64], sizes = [8, 32], strides = [1, 1]} : vector<8x128xf32> to vector<8x32xf32>
    %312 = math.tanh %311 : vector<8x32xf32>
    %313 = vector.extract_strided_slice %263 {offsets = [0, 96], sizes = [8, 32], strides = [1, 1]} : vector<8x128xf32> to vector<8x32xf32>
    %cst_110 = arith.constant 5.000000e-01 : f32
    %314 = vector.broadcast %cst_110 : f32 to vector<8x32xf32>
    %315 = arith.mulf %314, %313 : vector<8x32xf32>
    %316 = math.tanh %315 : vector<8x32xf32>
    %cst_111 = arith.constant 5.000000e-01 : f32
    %317 = vector.broadcast %cst_111 : f32 to vector<8x32xf32>
    %318 = arith.mulf %317, %316 : vector<8x32xf32>
    %cst_112 = arith.constant 5.000000e-01 : f32
    %319 = vector.broadcast %cst_112 : f32 to vector<8x32xf32>
    %320 = arith.addf %318, %319 : vector<8x32xf32>
    %321 = arith.mulf %310, %243 : vector<8x32xf32>
    %322 = arith.mulf %302, %312 : vector<8x32xf32>
    %323 = arith.addf %321, %322 : vector<8x32xf32>
    %324 = math.tanh %323 : vector<8x32xf32>
    %325 = arith.mulf %320, %324 : vector<8x32xf32>
    %326 = tpu.concatenate %294, %325 in 1 : vector<8x32xf32>, vector<8x32xf32> -> vector<8x64xf32>
    %327 = arith.index_cast %250 : i32 to index
    %c0_113 = arith.constant 0 : index
    %328 = vector.load %arg6[%327, %c0_113] : memref<64x64xf32, #tpu.memory_space<vmem>>, vector<8x64xf32>
    tpu.vector_store %arg6[%327, %c0_113], %326 {strides = array<i32>} : memref<64x64xf32, #tpu.memory_space<vmem>>, vector<8x64xf32>,
    %c4_i32 = arith.constant 4 : i32
    %c8_i32_114 = arith.constant 8 : i32
    %329 = arith.muli %c4_i32, %c8_i32_114 : i32
    %330 = tpu.assume_multiple %329, 8 : i32
    %c7_i32_115 = arith.constant 7 : i32
    %331 = arith.subi %c7_i32_115, %c4_i32 : i32
    %c8_i32_116 = arith.constant 8 : i32
    %332 = arith.muli %331, %c8_i32_116 : i32
    %333 = tpu.assume_multiple %332, 8 : i32
    %c0_117 = arith.constant 0 : index
    %c0_118 = arith.constant 0 : index
    %334 = vector.load %arg2[%c0_117, %c0_118] : memref<64x256xf32, #tpu.memory_space<vmem>>, vector<64x256xf32>
    %cst_119 = arith.constant dense<0.000000e+00> : vector<8x256xf32>
    %335 = tpu.matmul %326, %334, %cst_119 {dimension_numbers = #tpu.dot_dimension_numbers<[1], [0], [0], [1], [0, 0, 1, 1], [], []>} : vector<8x64xf32>, vector<64x256xf32>, vector<8x256xf32> -> vector<8x256xf32>
    %336 = arith.index_cast %330 : i32 to index
    %c0_120 = arith.constant 0 : index
    %337 = vector.load %arg5[%336, %c0_120] : memref<64x256xf32, #tpu.memory_space<vmem>>, vector<8x128xf32>
    %338 = vector.extract_strided_slice %335 {offsets = [0, 0], sizes = [8, 128], strides = [1, 1]} : vector<8x256xf32> to vector<8x128xf32>
    %339 = arith.addf %337, %338 : vector<8x128xf32>
    %340 = arith.index_cast %333 : i32 to index
    %c128_121 = arith.constant 128 : index
    %341 = vector.load %arg5[%340, %c128_121] : memref<64x256xf32, #tpu.memory_space<vmem>>, vector<8x128xf32>
    %342 = vector.extract_strided_slice %335 {offsets = [0, 128], sizes = [8, 128], strides = [1, 1]} : vector<8x256xf32> to vector<8x128xf32>
    %343 = arith.addf %341, %342 : vector<8x128xf32>
    %344 = vector.extract_strided_slice %339 {offsets = [0, 0], sizes = [8, 32], strides = [1, 1]} : vector<8x128xf32> to vector<8x32xf32>
    %cst_122 = arith.constant 5.000000e-01 : f32
    %345 = vector.broadcast %cst_122 : f32 to vector<8x32xf32>
    %346 = arith.mulf %345, %344 : vector<8x32xf32>
    %347 = math.tanh %346 : vector<8x32xf32>
    %cst_123 = arith.constant 5.000000e-01 : f32
    %348 = vector.broadcast %cst_123 : f32 to vector<8x32xf32>
    %349 = arith.mulf %348, %347 : vector<8x32xf32>
    %cst_124 = arith.constant 5.000000e-01 : f32
    %350 = vector.broadcast %cst_124 : f32 to vector<8x32xf32>
    %351 = arith.addf %349, %350 : vector<8x32xf32>
    %352 = vector.extract_strided_slice %339 {offsets = [0, 32], sizes = [8, 32], strides = [1, 1]} : vector<8x128xf32> to vector<8x32xf32>
    %cst_125 = arith.constant 5.000000e-01 : f32
    %353 = vector.broadcast %cst_125 : f32 to vector<8x32xf32>
    %354 = arith.mulf %353, %352 : vector<8x32xf32>
    %355 = math.tanh %354 : vector<8x32xf32>
    %cst_126 = arith.constant 5.000000e-01 : f32
    %356 = vector.broadcast %cst_126 : f32 to vector<8x32xf32>
    %357 = arith.mulf %356, %355 : vector<8x32xf32>
    %cst_127 = arith.constant 5.000000e-01 : f32
    %358 = vector.broadcast %cst_127 : f32 to vector<8x32xf32>
    %359 = arith.addf %357, %358 : vector<8x32xf32>
    %360 = vector.extract_strided_slice %339 {offsets = [0, 64], sizes = [8, 32], strides = [1, 1]} : vector<8x128xf32> to vector<8x32xf32>
    %361 = math.tanh %360 : vector<8x32xf32>
    %362 = vector.extract_strided_slice %339 {offsets = [0, 96], sizes = [8, 32], strides = [1, 1]} : vector<8x128xf32> to vector<8x32xf32>
    %cst_128 = arith.constant 5.000000e-01 : f32
    %363 = vector.broadcast %cst_128 : f32 to vector<8x32xf32>
    %364 = arith.mulf %363, %362 : vector<8x32xf32>
    %365 = math.tanh %364 : vector<8x32xf32>
    %cst_129 = arith.constant 5.000000e-01 : f32
    %366 = vector.broadcast %cst_129 : f32 to vector<8x32xf32>
    %367 = arith.mulf %366, %365 : vector<8x32xf32>
    %cst_130 = arith.constant 5.000000e-01 : f32
    %368 = vector.broadcast %cst_130 : f32 to vector<8x32xf32>
    %369 = arith.addf %367, %368 : vector<8x32xf32>
    %370 = arith.mulf %359, %292 : vector<8x32xf32>
    %371 = arith.mulf %351, %361 : vector<8x32xf32>
    %372 = arith.addf %370, %371 : vector<8x32xf32>
    %373 = math.tanh %372 : vector<8x32xf32>
    %374 = arith.mulf %369, %373 : vector<8x32xf32>
    %375 = vector.extract_strided_slice %343 {offsets = [0, 0], sizes = [8, 32], strides = [1, 1]} : vector<8x128xf32> to vector<8x32xf32>
    %cst_131 = arith.constant 5.000000e-01 : f32
    %376 = vector.broadcast %cst_131 : f32 to vector<8x32xf32>
    %377 = arith.mulf %376, %375 : vector<8x32xf32>
    %378 = math.tanh %377 : vector<8x32xf32>
    %cst_132 = arith.constant 5.000000e-01 : f32
    %379 = vector.broadcast %cst_132 : f32 to vector<8x32xf32>
    %380 = arith.mulf %379, %378 : vector<8x32xf32>
    %cst_133 = arith.constant 5.000000e-01 : f32
    %381 = vector.broadcast %cst_133 : f32 to vector<8x32xf32>
    %382 = arith.addf %380, %381 : vector<8x32xf32>
    %383 = vector.extract_strided_slice %343 {offsets = [0, 32], sizes = [8, 32], strides = [1, 1]} : vector<8x128xf32> to vector<8x32xf32>
    %cst_134 = arith.constant 5.000000e-01 : f32
    %384 = vector.broadcast %cst_134 : f32 to vector<8x32xf32>
    %385 = arith.mulf %384, %383 : vector<8x32xf32>
    %386 = math.tanh %385 : vector<8x32xf32>
    %cst_135 = arith.constant 5.000000e-01 : f32
    %387 = vector.broadcast %cst_135 : f32 to vector<8x32xf32>
    %388 = arith.mulf %387, %386 : vector<8x32xf32>
    %cst_136 = arith.constant 5.000000e-01 : f32
    %389 = vector.broadcast %cst_136 : f32 to vector<8x32xf32>
    %390 = arith.addf %388, %389 : vector<8x32xf32>
    %391 = vector.extract_strided_slice %343 {offsets = [0, 64], sizes = [8, 32], strides = [1, 1]} : vector<8x128xf32> to vector<8x32xf32>
    %392 = math.tanh %391 : vector<8x32xf32>
    %393 = vector.extract_strided_slice %343 {offsets = [0, 96], sizes = [8, 32], strides = [1, 1]} : vector<8x128xf32> to vector<8x32xf32>
    %cst_137 = arith.constant 5.000000e-01 : f32
    %394 = vector.broadcast %cst_137 : f32 to vector<8x32xf32>
    %395 = arith.mulf %394, %393 : vector<8x32xf32>
    %396 = math.tanh %395 : vector<8x32xf32>
    %cst_138 = arith.constant 5.000000e-01 : f32
    %397 = vector.broadcast %cst_138 : f32 to vector<8x32xf32>
    %398 = arith.mulf %397, %396 : vector<8x32xf32>
    %cst_139 = arith.constant 5.000000e-01 : f32
    %399 = vector.broadcast %cst_139 : f32 to vector<8x32xf32>
    %400 = arith.addf %398, %399 : vector<8x32xf32>
    %401 = arith.mulf %390, %323 : vector<8x32xf32>
    %402 = arith.mulf %382, %392 : vector<8x32xf32>
    %403 = arith.addf %401, %402 : vector<8x32xf32>
    %404 = math.tanh %403 : vector<8x32xf32>
    %405 = arith.mulf %400, %404 : vector<8x32xf32>
    %406 = tpu.concatenate %374, %405 in 1 : vector<8x32xf32>, vector<8x32xf32> -> vector<8x64xf32>
    %407 = arith.index_cast %330 : i32 to index
    %c0_140 = arith.constant 0 : index
    %408 = vector.load %arg6[%407, %c0_140] : memref<64x64xf32, #tpu.memory_space<vmem>>, vector<8x64xf32>
    tpu.vector_store %arg6[%407, %c0_140], %406 {strides = array<i32>} : memref<64x64xf32, #tpu.memory_space<vmem>>, vector<8x64xf32>,
    %c5_i32 = arith.constant 5 : i32
    %c8_i32_141 = arith.constant 8 : i32
    %409 = arith.muli %c5_i32, %c8_i32_141 : i32
    %410 = tpu.assume_multiple %409, 8 : i32
    %c7_i32_142 = arith.constant 7 : i32
    %411 = arith.subi %c7_i32_142, %c5_i32 : i32
    %c8_i32_143 = arith.constant 8 : i32
    %412 = arith.muli %411, %c8_i32_143 : i32
    %413 = tpu.assume_multiple %412, 8 : i32
    %c0_144 = arith.constant 0 : index
    %c0_145 = arith.constant 0 : index
    %414 = vector.load %arg2[%c0_144, %c0_145] : memref<64x256xf32, #tpu.memory_space<vmem>>, vector<64x256xf32>
    %cst_146 = arith.constant dense<0.000000e+00> : vector<8x256xf32>
    %415 = tpu.matmul %406, %414, %cst_146 {dimension_numbers = #tpu.dot_dimension_numbers<[1], [0], [0], [1], [0, 0, 1, 1], [], []>} : vector<8x64xf32>, vector<64x256xf32>, vector<8x256xf32> -> vector<8x256xf32>
    %416 = arith.index_cast %410 : i32 to index
    %c0_147 = arith.constant 0 : index
    %417 = vector.load %arg5[%416, %c0_147] : memref<64x256xf32, #tpu.memory_space<vmem>>, vector<8x128xf32>
    %418 = vector.extract_strided_slice %415 {offsets = [0, 0], sizes = [8, 128], strides = [1, 1]} : vector<8x256xf32> to vector<8x128xf32>
    %419 = arith.addf %417, %418 : vector<8x128xf32>
    %420 = arith.index_cast %413 : i32 to index
    %c128_148 = arith.constant 128 : index
    %421 = vector.load %arg5[%420, %c128_148] : memref<64x256xf32, #tpu.memory_space<vmem>>, vector<8x128xf32>
    %422 = vector.extract_strided_slice %415 {offsets = [0, 128], sizes = [8, 128], strides = [1, 1]} : vector<8x256xf32> to vector<8x128xf32>
    %423 = arith.addf %421, %422 : vector<8x128xf32>
    %424 = vector.extract_strided_slice %419 {offsets = [0, 0], sizes = [8, 32], strides = [1, 1]} : vector<8x128xf32> to vector<8x32xf32>
    %cst_149 = arith.constant 5.000000e-01 : f32
    %425 = vector.broadcast %cst_149 : f32 to vector<8x32xf32>
    %426 = arith.mulf %425, %424 : vector<8x32xf32>
    %427 = math.tanh %426 : vector<8x32xf32>
    %cst_150 = arith.constant 5.000000e-01 : f32
    %428 = vector.broadcast %cst_150 : f32 to vector<8x32xf32>
    %429 = arith.mulf %428, %427 : vector<8x32xf32>
    %cst_151 = arith.constant 5.000000e-01 : f32
    %430 = vector.broadcast %cst_151 : f32 to vector<8x32xf32>
    %431 = arith.addf %429, %430 : vector<8x32xf32>
    %432 = vector.extract_strided_slice %419 {offsets = [0, 32], sizes = [8, 32], strides = [1, 1]} : vector<8x128xf32> to vector<8x32xf32>
    %cst_152 = arith.constant 5.000000e-01 : f32
    %433 = vector.broadcast %cst_152 : f32 to vector<8x32xf32>
    %434 = arith.mulf %433, %432 : vector<8x32xf32>
    %435 = math.tanh %434 : vector<8x32xf32>
    %cst_153 = arith.constant 5.000000e-01 : f32
    %436 = vector.broadcast %cst_153 : f32 to vector<8x32xf32>
    %437 = arith.mulf %436, %435 : vector<8x32xf32>
    %cst_154 = arith.constant 5.000000e-01 : f32
    %438 = vector.broadcast %cst_154 : f32 to vector<8x32xf32>
    %439 = arith.addf %437, %438 : vector<8x32xf32>
    %440 = vector.extract_strided_slice %419 {offsets = [0, 64], sizes = [8, 32], strides = [1, 1]} : vector<8x128xf32> to vector<8x32xf32>
    %441 = math.tanh %440 : vector<8x32xf32>
    %442 = vector.extract_strided_slice %419 {offsets = [0, 96], sizes = [8, 32], strides = [1, 1]} : vector<8x128xf32> to vector<8x32xf32>
    %cst_155 = arith.constant 5.000000e-01 : f32
    %443 = vector.broadcast %cst_155 : f32 to vector<8x32xf32>
    %444 = arith.mulf %443, %442 : vector<8x32xf32>
    %445 = math.tanh %444 : vector<8x32xf32>
    %cst_156 = arith.constant 5.000000e-01 : f32
    %446 = vector.broadcast %cst_156 : f32 to vector<8x32xf32>
    %447 = arith.mulf %446, %445 : vector<8x32xf32>
    %cst_157 = arith.constant 5.000000e-01 : f32
    %448 = vector.broadcast %cst_157 : f32 to vector<8x32xf32>
    %449 = arith.addf %447, %448 : vector<8x32xf32>
    %450 = arith.mulf %439, %372 : vector<8x32xf32>
    %451 = arith.mulf %431, %441 : vector<8x32xf32>
    %452 = arith.addf %450, %451 : vector<8x32xf32>
    %453 = math.tanh %452 : vector<8x32xf32>
    %454 = arith.mulf %449, %453 : vector<8x32xf32>
    %455 = vector.extract_strided_slice %423 {offsets = [0, 0], sizes = [8, 32], strides = [1, 1]} : vector<8x128xf32> to vector<8x32xf32>
    %cst_158 = arith.constant 5.000000e-01 : f32
    %456 = vector.broadcast %cst_158 : f32 to vector<8x32xf32>
    %457 = arith.mulf %456, %455 : vector<8x32xf32>
    %458 = math.tanh %457 : vector<8x32xf32>
    %cst_159 = arith.constant 5.000000e-01 : f32
    %459 = vector.broadcast %cst_159 : f32 to vector<8x32xf32>
    %460 = arith.mulf %459, %458 : vector<8x32xf32>
    %cst_160 = arith.constant 5.000000e-01 : f32
    %461 = vector.broadcast %cst_160 : f32 to vector<8x32xf32>
    %462 = arith.addf %460, %461 : vector<8x32xf32>
    %463 = vector.extract_strided_slice %423 {offsets = [0, 32], sizes = [8, 32], strides = [1, 1]} : vector<8x128xf32> to vector<8x32xf32>
    %cst_161 = arith.constant 5.000000e-01 : f32
    %464 = vector.broadcast %cst_161 : f32 to vector<8x32xf32>
    %465 = arith.mulf %464, %463 : vector<8x32xf32>
    %466 = math.tanh %465 : vector<8x32xf32>
    %cst_162 = arith.constant 5.000000e-01 : f32
    %467 = vector.broadcast %cst_162 : f32 to vector<8x32xf32>
    %468 = arith.mulf %467, %466 : vector<8x32xf32>
    %cst_163 = arith.constant 5.000000e-01 : f32
    %469 = vector.broadcast %cst_163 : f32 to vector<8x32xf32>
    %470 = arith.addf %468, %469 : vector<8x32xf32>
    %471 = vector.extract_strided_slice %423 {offsets = [0, 64], sizes = [8, 32], strides = [1, 1]} : vector<8x128xf32> to vector<8x32xf32>
    %472 = math.tanh %471 : vector<8x32xf32>
    %473 = vector.extract_strided_slice %423 {offsets = [0, 96], sizes = [8, 32], strides = [1, 1]} : vector<8x128xf32> to vector<8x32xf32>
    %cst_164 = arith.constant 5.000000e-01 : f32
    %474 = vector.broadcast %cst_164 : f32 to vector<8x32xf32>
    %475 = arith.mulf %474, %473 : vector<8x32xf32>
    %476 = math.tanh %475 : vector<8x32xf32>
    %cst_165 = arith.constant 5.000000e-01 : f32
    %477 = vector.broadcast %cst_165 : f32 to vector<8x32xf32>
    %478 = arith.mulf %477, %476 : vector<8x32xf32>
    %cst_166 = arith.constant 5.000000e-01 : f32
    %479 = vector.broadcast %cst_166 : f32 to vector<8x32xf32>
    %480 = arith.addf %478, %479 : vector<8x32xf32>
    %481 = arith.mulf %470, %403 : vector<8x32xf32>
    %482 = arith.mulf %462, %472 : vector<8x32xf32>
    %483 = arith.addf %481, %482 : vector<8x32xf32>
    %484 = math.tanh %483 : vector<8x32xf32>
    %485 = arith.mulf %480, %484 : vector<8x32xf32>
    %486 = tpu.concatenate %454, %485 in 1 : vector<8x32xf32>, vector<8x32xf32> -> vector<8x64xf32>
    %487 = arith.index_cast %410 : i32 to index
    %c0_167 = arith.constant 0 : index
    %488 = vector.load %arg6[%487, %c0_167] : memref<64x64xf32, #tpu.memory_space<vmem>>, vector<8x64xf32>
    tpu.vector_store %arg6[%487, %c0_167], %486 {strides = array<i32>} : memref<64x64xf32, #tpu.memory_space<vmem>>, vector<8x64xf32>,
    %c6_i32 = arith.constant 6 : i32
    %c8_i32_168 = arith.constant 8 : i32
    %489 = arith.muli %c6_i32, %c8_i32_168 : i32
    %490 = tpu.assume_multiple %489, 8 : i32
    %c7_i32_169 = arith.constant 7 : i32
    %491 = arith.subi %c7_i32_169, %c6_i32 : i32
    %c8_i32_170 = arith.constant 8 : i32
    %492 = arith.muli %491, %c8_i32_170 : i32
    %493 = tpu.assume_multiple %492, 8 : i32
    %c0_171 = arith.constant 0 : index
    %c0_172 = arith.constant 0 : index
    %494 = vector.load %arg2[%c0_171, %c0_172] : memref<64x256xf32, #tpu.memory_space<vmem>>, vector<64x256xf32>
    %cst_173 = arith.constant dense<0.000000e+00> : vector<8x256xf32>
    %495 = tpu.matmul %486, %494, %cst_173 {dimension_numbers = #tpu.dot_dimension_numbers<[1], [0], [0], [1], [0, 0, 1, 1], [], []>} : vector<8x64xf32>, vector<64x256xf32>, vector<8x256xf32> -> vector<8x256xf32>
    %496 = arith.index_cast %490 : i32 to index
    %c0_174 = arith.constant 0 : index
    %497 = vector.load %arg5[%496, %c0_174] : memref<64x256xf32, #tpu.memory_space<vmem>>, vector<8x128xf32>
    %498 = vector.extract_strided_slice %495 {offsets = [0, 0], sizes = [8, 128], strides = [1, 1]} : vector<8x256xf32> to vector<8x128xf32>
    %499 = arith.addf %497, %498 : vector<8x128xf32>
    %500 = arith.index_cast %493 : i32 to index
    %c128_175 = arith.constant 128 : index
    %501 = vector.load %arg5[%500, %c128_175] : memref<64x256xf32, #tpu.memory_space<vmem>>, vector<8x128xf32>
    %502 = vector.extract_strided_slice %495 {offsets = [0, 128], sizes = [8, 128], strides = [1, 1]} : vector<8x256xf32> to vector<8x128xf32>
    %503 = arith.addf %501, %502 : vector<8x128xf32>
    %504 = vector.extract_strided_slice %499 {offsets = [0, 0], sizes = [8, 32], strides = [1, 1]} : vector<8x128xf32> to vector<8x32xf32>
    %cst_176 = arith.constant 5.000000e-01 : f32
    %505 = vector.broadcast %cst_176 : f32 to vector<8x32xf32>
    %506 = arith.mulf %505, %504 : vector<8x32xf32>
    %507 = math.tanh %506 : vector<8x32xf32>
    %cst_177 = arith.constant 5.000000e-01 : f32
    %508 = vector.broadcast %cst_177 : f32 to vector<8x32xf32>
    %509 = arith.mulf %508, %507 : vector<8x32xf32>
    %cst_178 = arith.constant 5.000000e-01 : f32
    %510 = vector.broadcast %cst_178 : f32 to vector<8x32xf32>
    %511 = arith.addf %509, %510 : vector<8x32xf32>
    %512 = vector.extract_strided_slice %499 {offsets = [0, 32], sizes = [8, 32], strides = [1, 1]} : vector<8x128xf32> to vector<8x32xf32>
    %cst_179 = arith.constant 5.000000e-01 : f32
    %513 = vector.broadcast %cst_179 : f32 to vector<8x32xf32>
    %514 = arith.mulf %513, %512 : vector<8x32xf32>
    %515 = math.tanh %514 : vector<8x32xf32>
    %cst_180 = arith.constant 5.000000e-01 : f32
    %516 = vector.broadcast %cst_180 : f32 to vector<8x32xf32>
    %517 = arith.mulf %516, %515 : vector<8x32xf32>
    %cst_181 = arith.constant 5.000000e-01 : f32
    %518 = vector.broadcast %cst_181 : f32 to vector<8x32xf32>
    %519 = arith.addf %517, %518 : vector<8x32xf32>
    %520 = vector.extract_strided_slice %499 {offsets = [0, 64], sizes = [8, 32], strides = [1, 1]} : vector<8x128xf32> to vector<8x32xf32>
    %521 = math.tanh %520 : vector<8x32xf32>
    %522 = vector.extract_strided_slice %499 {offsets = [0, 96], sizes = [8, 32], strides = [1, 1]} : vector<8x128xf32> to vector<8x32xf32>
    %cst_182 = arith.constant 5.000000e-01 : f32
    %523 = vector.broadcast %cst_182 : f32 to vector<8x32xf32>
    %524 = arith.mulf %523, %522 : vector<8x32xf32>
    %525 = math.tanh %524 : vector<8x32xf32>
    %cst_183 = arith.constant 5.000000e-01 : f32
    %526 = vector.broadcast %cst_183 : f32 to vector<8x32xf32>
    %527 = arith.mulf %526, %525 : vector<8x32xf32>
    %cst_184 = arith.constant 5.000000e-01 : f32
    %528 = vector.broadcast %cst_184 : f32 to vector<8x32xf32>
    %529 = arith.addf %527, %528 : vector<8x32xf32>
    %530 = arith.mulf %519, %452 : vector<8x32xf32>
    %531 = arith.mulf %511, %521 : vector<8x32xf32>
    %532 = arith.addf %530, %531 : vector<8x32xf32>
    %533 = math.tanh %532 : vector<8x32xf32>
    %534 = arith.mulf %529, %533 : vector<8x32xf32>
    %535 = vector.extract_strided_slice %503 {offsets = [0, 0], sizes = [8, 32], strides = [1, 1]} : vector<8x128xf32> to vector<8x32xf32>
    %cst_185 = arith.constant 5.000000e-01 : f32
    %536 = vector.broadcast %cst_185 : f32 to vector<8x32xf32>
    %537 = arith.mulf %536, %535 : vector<8x32xf32>
    %538 = math.tanh %537 : vector<8x32xf32>
    %cst_186 = arith.constant 5.000000e-01 : f32
    %539 = vector.broadcast %cst_186 : f32 to vector<8x32xf32>
    %540 = arith.mulf %539, %538 : vector<8x32xf32>
    %cst_187 = arith.constant 5.000000e-01 : f32
    %541 = vector.broadcast %cst_187 : f32 to vector<8x32xf32>
    %542 = arith.addf %540, %541 : vector<8x32xf32>
    %543 = vector.extract_strided_slice %503 {offsets = [0, 32], sizes = [8, 32], strides = [1, 1]} : vector<8x128xf32> to vector<8x32xf32>
    %cst_188 = arith.constant 5.000000e-01 : f32
    %544 = vector.broadcast %cst_188 : f32 to vector<8x32xf32>
    %545 = arith.mulf %544, %543 : vector<8x32xf32>
    %546 = math.tanh %545 : vector<8x32xf32>
    %cst_189 = arith.constant 5.000000e-01 : f32
    %547 = vector.broadcast %cst_189 : f32 to vector<8x32xf32>
    %548 = arith.mulf %547, %546 : vector<8x32xf32>
    %cst_190 = arith.constant 5.000000e-01 : f32
    %549 = vector.broadcast %cst_190 : f32 to vector<8x32xf32>
    %550 = arith.addf %548, %549 : vector<8x32xf32>
    %551 = vector.extract_strided_slice %503 {offsets = [0, 64], sizes = [8, 32], strides = [1, 1]} : vector<8x128xf32> to vector<8x32xf32>
    %552 = math.tanh %551 : vector<8x32xf32>
    %553 = vector.extract_strided_slice %503 {offsets = [0, 96], sizes = [8, 32], strides = [1, 1]} : vector<8x128xf32> to vector<8x32xf32>
    %cst_191 = arith.constant 5.000000e-01 : f32
    %554 = vector.broadcast %cst_191 : f32 to vector<8x32xf32>
    %555 = arith.mulf %554, %553 : vector<8x32xf32>
    %556 = math.tanh %555 : vector<8x32xf32>
    %cst_192 = arith.constant 5.000000e-01 : f32
    %557 = vector.broadcast %cst_192 : f32 to vector<8x32xf32>
    %558 = arith.mulf %557, %556 : vector<8x32xf32>
    %cst_193 = arith.constant 5.000000e-01 : f32
    %559 = vector.broadcast %cst_193 : f32 to vector<8x32xf32>
    %560 = arith.addf %558, %559 : vector<8x32xf32>
    %561 = arith.mulf %550, %483 : vector<8x32xf32>
    %562 = arith.mulf %542, %552 : vector<8x32xf32>
    %563 = arith.addf %561, %562 : vector<8x32xf32>
    %564 = math.tanh %563 : vector<8x32xf32>
    %565 = arith.mulf %560, %564 : vector<8x32xf32>
    %566 = tpu.concatenate %534, %565 in 1 : vector<8x32xf32>, vector<8x32xf32> -> vector<8x64xf32>
    %567 = arith.index_cast %490 : i32 to index
    %c0_194 = arith.constant 0 : index
    %568 = vector.load %arg6[%567, %c0_194] : memref<64x64xf32, #tpu.memory_space<vmem>>, vector<8x64xf32>
    tpu.vector_store %arg6[%567, %c0_194], %566 {strides = array<i32>} : memref<64x64xf32, #tpu.memory_space<vmem>>, vector<8x64xf32>,
    %c7_i32_195 = arith.constant 7 : i32
    %c8_i32_196 = arith.constant 8 : i32
    %569 = arith.muli %c7_i32_195, %c8_i32_196 : i32
    %570 = tpu.assume_multiple %569, 8 : i32
    %c7_i32_197 = arith.constant 7 : i32
    %571 = arith.subi %c7_i32_197, %c7_i32_195 : i32
    %c8_i32_198 = arith.constant 8 : i32
    %572 = arith.muli %571, %c8_i32_198 : i32
    %573 = tpu.assume_multiple %572, 8 : i32
    %c0_199 = arith.constant 0 : index
    %c0_200 = arith.constant 0 : index
    %574 = vector.load %arg2[%c0_199, %c0_200] : memref<64x256xf32, #tpu.memory_space<vmem>>, vector<64x256xf32>
    %cst_201 = arith.constant dense<0.000000e+00> : vector<8x256xf32>
    %575 = tpu.matmul %566, %574, %cst_201 {dimension_numbers = #tpu.dot_dimension_numbers<[1], [0], [0], [1], [0, 0, 1, 1], [], []>} : vector<8x64xf32>, vector<64x256xf32>, vector<8x256xf32> -> vector<8x256xf32>
    %576 = arith.index_cast %570 : i32 to index
    %c0_202 = arith.constant 0 : index
    %577 = vector.load %arg5[%576, %c0_202] : memref<64x256xf32, #tpu.memory_space<vmem>>, vector<8x128xf32>
    %578 = vector.extract_strided_slice %575 {offsets = [0, 0], sizes = [8, 128], strides = [1, 1]} : vector<8x256xf32> to vector<8x128xf32>
    %579 = arith.addf %577, %578 : vector<8x128xf32>
    %580 = arith.index_cast %573 : i32 to index
    %c128_203 = arith.constant 128 : index
    %581 = vector.load %arg5[%580, %c128_203] : memref<64x256xf32, #tpu.memory_space<vmem>>, vector<8x128xf32>
    %582 = vector.extract_strided_slice %575 {offsets = [0, 128], sizes = [8, 128], strides = [1, 1]} : vector<8x256xf32> to vector<8x128xf32>
    %583 = arith.addf %581, %582 : vector<8x128xf32>
    %584 = vector.extract_strided_slice %579 {offsets = [0, 0], sizes = [8, 32], strides = [1, 1]} : vector<8x128xf32> to vector<8x32xf32>
    %cst_204 = arith.constant 5.000000e-01 : f32
    %585 = vector.broadcast %cst_204 : f32 to vector<8x32xf32>
    %586 = arith.mulf %585, %584 : vector<8x32xf32>
    %587 = math.tanh %586 : vector<8x32xf32>
    %cst_205 = arith.constant 5.000000e-01 : f32
    %588 = vector.broadcast %cst_205 : f32 to vector<8x32xf32>
    %589 = arith.mulf %588, %587 : vector<8x32xf32>
    %cst_206 = arith.constant 5.000000e-01 : f32
    %590 = vector.broadcast %cst_206 : f32 to vector<8x32xf32>
    %591 = arith.addf %589, %590 : vector<8x32xf32>
    %592 = vector.extract_strided_slice %579 {offsets = [0, 32], sizes = [8, 32], strides = [1, 1]} : vector<8x128xf32> to vector<8x32xf32>
    %cst_207 = arith.constant 5.000000e-01 : f32
    %593 = vector.broadcast %cst_207 : f32 to vector<8x32xf32>
    %594 = arith.mulf %593, %592 : vector<8x32xf32>
    %595 = math.tanh %594 : vector<8x32xf32>
    %cst_208 = arith.constant 5.000000e-01 : f32
    %596 = vector.broadcast %cst_208 : f32 to vector<8x32xf32>
    %597 = arith.mulf %596, %595 : vector<8x32xf32>
    %cst_209 = arith.constant 5.000000e-01 : f32
    %598 = vector.broadcast %cst_209 : f32 to vector<8x32xf32>
    %599 = arith.addf %597, %598 : vector<8x32xf32>
    %600 = vector.extract_strided_slice %579 {offsets = [0, 64], sizes = [8, 32], strides = [1, 1]} : vector<8x128xf32> to vector<8x32xf32>
    %601 = math.tanh %600 : vector<8x32xf32>
    %602 = vector.extract_strided_slice %579 {offsets = [0, 96], sizes = [8, 32], strides = [1, 1]} : vector<8x128xf32> to vector<8x32xf32>
    %cst_210 = arith.constant 5.000000e-01 : f32
    %603 = vector.broadcast %cst_210 : f32 to vector<8x32xf32>
    %604 = arith.mulf %603, %602 : vector<8x32xf32>
    %605 = math.tanh %604 : vector<8x32xf32>
    %cst_211 = arith.constant 5.000000e-01 : f32
    %606 = vector.broadcast %cst_211 : f32 to vector<8x32xf32>
    %607 = arith.mulf %606, %605 : vector<8x32xf32>
    %cst_212 = arith.constant 5.000000e-01 : f32
    %608 = vector.broadcast %cst_212 : f32 to vector<8x32xf32>
    %609 = arith.addf %607, %608 : vector<8x32xf32>
    %610 = arith.mulf %599, %532 : vector<8x32xf32>
    %611 = arith.mulf %591, %601 : vector<8x32xf32>
    %612 = arith.addf %610, %611 : vector<8x32xf32>
    %613 = math.tanh %612 : vector<8x32xf32>
    %614 = arith.mulf %609, %613 : vector<8x32xf32>
    %615 = vector.extract_strided_slice %583 {offsets = [0, 0], sizes = [8, 32], strides = [1, 1]} : vector<8x128xf32> to vector<8x32xf32>
    %cst_213 = arith.constant 5.000000e-01 : f32
    %616 = vector.broadcast %cst_213 : f32 to vector<8x32xf32>
    %617 = arith.mulf %616, %615 : vector<8x32xf32>
    %618 = math.tanh %617 : vector<8x32xf32>
    %cst_214 = arith.constant 5.000000e-01 : f32
    %619 = vector.broadcast %cst_214 : f32 to vector<8x32xf32>
    %620 = arith.mulf %619, %618 : vector<8x32xf32>
    %cst_215 = arith.constant 5.000000e-01 : f32
    %621 = vector.broadcast %cst_215 : f32 to vector<8x32xf32>
    %622 = arith.addf %620, %621 : vector<8x32xf32>
    %623 = vector.extract_strided_slice %583 {offsets = [0, 32], sizes = [8, 32], strides = [1, 1]} : vector<8x128xf32> to vector<8x32xf32>
    %cst_216 = arith.constant 5.000000e-01 : f32
    %624 = vector.broadcast %cst_216 : f32 to vector<8x32xf32>
    %625 = arith.mulf %624, %623 : vector<8x32xf32>
    %626 = math.tanh %625 : vector<8x32xf32>
    %cst_217 = arith.constant 5.000000e-01 : f32
    %627 = vector.broadcast %cst_217 : f32 to vector<8x32xf32>
    %628 = arith.mulf %627, %626 : vector<8x32xf32>
    %cst_218 = arith.constant 5.000000e-01 : f32
    %629 = vector.broadcast %cst_218 : f32 to vector<8x32xf32>
    %630 = arith.addf %628, %629 : vector<8x32xf32>
    %631 = vector.extract_strided_slice %583 {offsets = [0, 64], sizes = [8, 32], strides = [1, 1]} : vector<8x128xf32> to vector<8x32xf32>
    %632 = math.tanh %631 : vector<8x32xf32>
    %633 = vector.extract_strided_slice %583 {offsets = [0, 96], sizes = [8, 32], strides = [1, 1]} : vector<8x128xf32> to vector<8x32xf32>
    %cst_219 = arith.constant 5.000000e-01 : f32
    %634 = vector.broadcast %cst_219 : f32 to vector<8x32xf32>
    %635 = arith.mulf %634, %633 : vector<8x32xf32>
    %636 = math.tanh %635 : vector<8x32xf32>
    %cst_220 = arith.constant 5.000000e-01 : f32
    %637 = vector.broadcast %cst_220 : f32 to vector<8x32xf32>
    %638 = arith.mulf %637, %636 : vector<8x32xf32>
    %cst_221 = arith.constant 5.000000e-01 : f32
    %639 = vector.broadcast %cst_221 : f32 to vector<8x32xf32>
    %640 = arith.addf %638, %639 : vector<8x32xf32>
    %641 = arith.mulf %630, %563 : vector<8x32xf32>
    %642 = arith.mulf %622, %632 : vector<8x32xf32>
    %643 = arith.addf %641, %642 : vector<8x32xf32>
    %644 = math.tanh %643 : vector<8x32xf32>
    %645 = arith.mulf %640, %644 : vector<8x32xf32>
    %646 = tpu.concatenate %614, %645 in 1 : vector<8x32xf32>, vector<8x32xf32> -> vector<8x64xf32>
    %647 = arith.index_cast %570 : i32 to index
    %c0_222 = arith.constant 0 : index
    %648 = vector.load %arg6[%647, %c0_222] : memref<64x64xf32, #tpu.memory_space<vmem>>, vector<8x64xf32>
    tpu.vector_store %arg6[%647, %c0_222], %646 {strides = array<i32>} : memref<64x64xf32, #tpu.memory_space<vmem>>, vector<8x64xf32>,
    %c8_i32_223 = arith.constant 8 : i32
    %c0_224 = arith.constant 0 : index
    %c0_225 = arith.constant 0 : index
    %649 = vector.load %arg6[%c0_224, %c0_225] : memref<64x64xf32, #tpu.memory_space<vmem>>, vector<8x32xf32>
    %c56 = arith.constant 56 : index
    %c32 = arith.constant 32 : index
    %650 = vector.load %arg6[%c56, %c32] : memref<64x64xf32, #tpu.memory_space<vmem>>, vector<8x32xf32>
    %651 = tpu.concatenate %649, %650 in 1 : vector<8x32xf32>, vector<8x32xf32> -> vector<8x64xf32>
    %c0_226 = arith.constant 0 : index
    %c0_227 = arith.constant 0 : index
    %652 = vector.load %arg4[%c0_226, %c0_227] : memref<64x64xf32, #tpu.memory_space<vmem>>, vector<8x64xf32>
    tpu.vector_store %arg4[%c0_226, %c0_227], %651 {strides = array<i32>} : memref<64x64xf32, #tpu.memory_space<vmem>>, vector<8x64xf32>,
    %c8 = arith.constant 8 : index
    %c0_228 = arith.constant 0 : index
    %653 = vector.load %arg6[%c8, %c0_228] : memref<64x64xf32, #tpu.memory_space<vmem>>, vector<8x32xf32>
    %c48 = arith.constant 48 : index
    %c32_229 = arith.constant 32 : index
    %654 = vector.load %arg6[%c48, %c32_229] : memref<64x64xf32, #tpu.memory_space<vmem>>, vector<8x32xf32>
    %655 = tpu.concatenate %653, %654 in 1 : vector<8x32xf32>, vector<8x32xf32> -> vector<8x64xf32>
    %c8_230 = arith.constant 8 : index
    %c0_231 = arith.constant 0 : index
    %656 = vector.load %arg4[%c8_230, %c0_231] : memref<64x64xf32, #tpu.memory_space<vmem>>, vector<8x64xf32>
    tpu.vector_store %arg4[%c8_230, %c0_231], %655 {strides = array<i32>} : memref<64x64xf32, #tpu.memory_space<vmem>>, vector<8x64xf32>,
    %c16 = arith.constant 16 : index
    %c0_232 = arith.constant 0 : index
    %657 = vector.load %arg6[%c16, %c0_232] : memref<64x64xf32, #tpu.memory_space<vmem>>, vector<8x32xf32>
    %c40 = arith.constant 40 : index
    %c32_233 = arith.constant 32 : index
    %658 = vector.load %arg6[%c40, %c32_233] : memref<64x64xf32, #tpu.memory_space<vmem>>, vector<8x32xf32>
    %659 = tpu.concatenate %657, %658 in 1 : vector<8x32xf32>, vector<8x32xf32> -> vector<8x64xf32>
    %c16_234 = arith.constant 16 : index
    %c0_235 = arith.constant 0 : index
    %660 = vector.load %arg4[%c16_234, %c0_235] : memref<64x64xf32, #tpu.memory_space<vmem>>, vector<8x64xf32>
    tpu.vector_store %arg4[%c16_234, %c0_235], %659 {strides = array<i32>} : memref<64x64xf32, #tpu.memory_space<vmem>>, vector<8x64xf32>,
    %c24 = arith.constant 24 : index
    %c0_236 = arith.constant 0 : index
    %661 = vector.load %arg6[%c24, %c0_236] : memref<64x64xf32, #tpu.memory_space<vmem>>, vector<8x32xf32>
    %c32_237 = arith.constant 32 : index
    %c32_238 = arith.constant 32 : index
    %662 = vector.load %arg6[%c32_237, %c32_238] : memref<64x64xf32, #tpu.memory_space<vmem>>, vector<8x32xf32>
    %663 = tpu.concatenate %661, %662 in 1 : vector<8x32xf32>, vector<8x32xf32> -> vector<8x64xf32>
    %c24_239 = arith.constant 24 : index
    %c0_240 = arith.constant 0 : index
    %664 = vector.load %arg4[%c24_239, %c0_240] : memref<64x64xf32, #tpu.memory_space<vmem>>, vector<8x64xf32>
    tpu.vector_store %arg4[%c24_239, %c0_240], %663 {strides = array<i32>} : memref<64x64xf32, #tpu.memory_space<vmem>>, vector<8x64xf32>,
    %c32_241 = arith.constant 32 : index
    %c0_242 = arith.constant 0 : index
    %665 = vector.load %arg6[%c32_241, %c0_242] : memref<64x64xf32, #tpu.memory_space<vmem>>, vector<8x32xf32>
    %c24_243 = arith.constant 24 : index
    %c32_244 = arith.constant 32 : index
    %666 = vector.load %arg6[%c24_243, %c32_244] : memref<64x64xf32, #tpu.memory_space<vmem>>, vector<8x32xf32>
    %667 = tpu.concatenate %665, %666 in 1 : vector<8x32xf32>, vector<8x32xf32> -> vector<8x64xf32>
    %c32_245 = arith.constant 32 : index
    %c0_246 = arith.constant 0 : index
    %668 = vector.load %arg4[%c32_245, %c0_246] : memref<64x64xf32, #tpu.memory_space<vmem>>, vector<8x64xf32>
    tpu.vector_store %arg4[%c32_245, %c0_246], %667 {strides = array<i32>} : memref<64x64xf32, #tpu.memory_space<vmem>>, vector<8x64xf32>,
    %c40_247 = arith.constant 40 : index
    %c0_248 = arith.constant 0 : index
    %669 = vector.load %arg6[%c40_247, %c0_248] : memref<64x64xf32, #tpu.memory_space<vmem>>, vector<8x32xf32>
    %c16_249 = arith.constant 16 : index
    %c32_250 = arith.constant 32 : index
    %670 = vector.load %arg6[%c16_249, %c32_250] : memref<64x64xf32, #tpu.memory_space<vmem>>, vector<8x32xf32>
    %671 = tpu.concatenate %669, %670 in 1 : vector<8x32xf32>, vector<8x32xf32> -> vector<8x64xf32>
    %c40_251 = arith.constant 40 : index
    %c0_252 = arith.constant 0 : index
    %672 = vector.load %arg4[%c40_251, %c0_252] : memref<64x64xf32, #tpu.memory_space<vmem>>, vector<8x64xf32>
    tpu.vector_store %arg4[%c40_251, %c0_252], %671 {strides = array<i32>} : memref<64x64xf32, #tpu.memory_space<vmem>>, vector<8x64xf32>,
    %c48_253 = arith.constant 48 : index
    %c0_254 = arith.constant 0 : index
    %673 = vector.load %arg6[%c48_253, %c0_254] : memref<64x64xf32, #tpu.memory_space<vmem>>, vector<8x32xf32>
    %c8_255 = arith.constant 8 : index
    %c32_256 = arith.constant 32 : index
    %674 = vector.load %arg6[%c8_255, %c32_256] : memref<64x64xf32, #tpu.memory_space<vmem>>, vector<8x32xf32>
    %675 = tpu.concatenate %673, %674 in 1 : vector<8x32xf32>, vector<8x32xf32> -> vector<8x64xf32>
    %c48_257 = arith.constant 48 : index
    %c0_258 = arith.constant 0 : index
    %676 = vector.load %arg4[%c48_257, %c0_258] : memref<64x64xf32, #tpu.memory_space<vmem>>, vector<8x64xf32>
    tpu.vector_store %arg4[%c48_257, %c0_258], %675 {strides = array<i32>} : memref<64x64xf32, #tpu.memory_space<vmem>>, vector<8x64xf32>,
    %c56_259 = arith.constant 56 : index
    %c0_260 = arith.constant 0 : index
    %677 = vector.load %arg6[%c56_259, %c0_260] : memref<64x64xf32, #tpu.memory_space<vmem>>, vector<8x32xf32>
    %c0_261 = arith.constant 0 : index
    %c32_262 = arith.constant 32 : index
    %678 = vector.load %arg6[%c0_261, %c32_262] : memref<64x64xf32, #tpu.memory_space<vmem>>, vector<8x32xf32>
    %679 = tpu.concatenate %677, %678 in 1 : vector<8x32xf32>, vector<8x32xf32> -> vector<8x64xf32>
    %c56_263 = arith.constant 56 : index
    %c0_264 = arith.constant 0 : index
    %680 = vector.load %arg4[%c56_263, %c0_264] : memref<64x64xf32, #tpu.memory_space<vmem>>, vector<8x64xf32>
    tpu.vector_store %arg4[%c56_263, %c0_264], %679 {strides = array<i32>} : memref<64x64xf32, #tpu.memory_space<vmem>>, vector<8x64xf32>,
    return
  }
}

</mosaic_0001>

<bundles_post_ra>
// kernel: tpu_custom_call.1
= control target key start
LH: loop header
LB: loop body
LE: loop exit
PB: predicated region body
PF: predicated region fallthrough
CT: control target
= control target key end

     0   :  { %9 = vsyncpa [#allocation5], 0  ;;  %s2058_s0 = inlined_call_operand.vmem [shape: f32[64,16], index: 0, kind: input, shape index: {}]   ;;  %s2059_s1 = inlined_call_operand.vmem [shape: f32[16,256], index: 1, kind: input, shape index: {}]   ;;  %s2060_s2 = inlined_call_operand.hbm [shape: f32[64,256], index: 2, kind: input, shape index: {}]   ;;  %s2061_s3 = inlined_call_operand.vmem [shape: f32[1,256], index: 3, kind: input, shape index: {}]   ;;  %s2062_s4 = inlined_call_operand.hbm [shape: f32[64,64], index: 4, kind: output, shape index: {}]  }
   0x1   :  { %10 = vsyncpa [#allocation6], 0  ;;  %s1647_s15 = smov [#allocation4]  }
   0x2   :  { %s20_s16 = sshll.u32 %s1647_s15, 4  ;;  %s21_s16 = int_to_ptr.vmem [resolvable:$true] %s20_s16 }
   0x3   :  { %s1611_s17 = scalar_lea.vmem %s21_s16, 2048  ;;  %p1616_p1 = scmp.lt.s32.totalorder %s21_s16, %s21_s16 }
   0x4   :  { %p1612_p0 = scmp.ne.s32.totalorder %s21_s16, %s1611_s17  ;;  %p1617_p2 = scmp.lt.s32.totalorder %s1611_s17, %s1611_s17 }
   0x6   :  { %p1618_p3 = por %p1617_p2, %p1616_p1 }
   0x8   :  { %p1619_p4 = pnand %p1618_p3, %p1612_p0 }
   0xa   :  { %1622 = shalt.err (!%p1619_p4)
}
   0xb   :  { %s1648_s18 = smov 256   ;;  %s1649_s19 = smov 16  }
   0xc   :  { %26 = dma.hbm_to_vmem [thread:$0]  %s2060_s2, 2048, %s21_s16, [#allocation5], %s1648_s18, %s1648_s18, %s1649_s19  }
   0xd   :  { %1643 = dma.done.wait [#allocation5], 2048  }
   0xe   :  { %1644 = vsyncadd [#allocation5], 4294965248  ;;  %v1650_v0 = vmov 0.0   ;;  %v43_v1 = vld [vmem:[%s2059_s1 + $0x18] sm:$0xff]  ;;  %v42_v3 = vld [vmem:[%s2059_s1 + $0x10] sm:$0xff]  ;;  %vm56_vm0 = vcmask 130048   ;;  %v46_v29 = vlaneseq }
   0xf   :  { %145 = vmatprep.mubr.f32.mxu0 %v1650_v0  ;;  %294 = vmatprep.mubr.f32.mxu1 %v1650_v0  ;;  %v1689_v2 = vld [vmem:[#allocation4 + $0x78] sm:$0xff]  ;;  %v1695_v4 = vld [vmem:[#allocation4 + $0x70] sm:$0xff]  ;;  %v41_v5 = vld [vmem:[%s2059_s1 + $0x8] sm:$0xff]  ;;  %s1652_s19 = smov 32   ;;  %vm363_vm1 = vcmask 261120   ;;  %vm226_vm2 = vcmask 523264  }
  0x10   :  { %109 = vmatprep.subr.mxu0 %v43_v1  ;;  %246 = vmatprep.subr.mxu1 %v1689_v2  ;;  %v1700_v6 = vld [vmem:[#allocation4 + $0x68] sm:$0xff]  ;;  %v40_v7 = vld [vmem:[%s2059_s1] sm:$0xff]  ;;  %v1712_v10 = vld [vmem:[#allocation4 + $0x58] sm:$0xff]  ;;  %v47_v30 = vshrl.u32 %v46_v29, 7  ;;  %s1653_s20 = smov [#allocation7]  }
  0x11   :  { %110 = vmatpush1.msra.mxu0 %v42_v3  ;;  %247 = vmatpush1.msra.mxu1 %v1695_v4  ;;  %v1706_v8 = vld [vmem:[#allocation4 + $0x60] sm:$0xff]  ;;  %v1714_v11 = vld [vmem:[#allocation4 + $0x50] sm:$0xff]  ;;  %v1717_v12 = vld [vmem:[#allocation4 + $0x48] sm:$0xff]  ;;  %s1464_s21 = sshll.u32 %s1653_s20, 4  ;;  %s1465_s21 = int_to_ptr.vmem [resolvable:$true] %s1464_s21 }
  0x12   :  { %v32_v9 = vld [vmem:[%s2058_s0] sm:$0xff]  ;;  %111 = vmatprep.subr.mxu0 %v41_v5  ;;  %248 = vmatprep.subr.mxu1 %v1700_v6  ;;  %v33_v14 = vld [vmem:[%s2058_s0 + $0x8] sm:$0xff]  ;;  %v1728_v15 = vld [vmem:[#allocation4 + $0x38] sm:$0xff]  ;;  %v52_v31 = vsub.s32 1, %v47_v30  ;;  %v48_v33 = vsub.s32 0, %v47_v30  ;;  %s1623_s22 = scalar_lea.vmem %s1465_s21, 1024  ;;  %p1628_p6 = scmp.lt.s32.totalorder %s1465_s21, %s1465_s21 }
  0x13   :  { %112 = vmatpush1.msra.mxu0 %v40_v7  ;;  %249 = vmatpush1.msra.mxu1 %v1706_v8  ;;  %v1721_v13 = vld [vmem:[#allocation4 + $0x40] sm:$0xff]  ;;  %v1731_v16 = vld [vmem:[#allocation4 + $0x30] sm:$0xff]  ;;  %v1735_v17 = vld [vmem:[#allocation4 + $0x28] sm:$0xff]  ;;  %p1624_p5 = scmp.ne.s32.totalorder %s1465_s21, %s1623_s22  ;;  %p1629_p7 = scmp.lt.s32.totalorder %s1623_s22, %s1623_s22 }
  0x14   :  { %1483 = vmatmul.mubr.msk.f32.vlgmr.msra.gmra.mxu0 %vm56_vm0, %v32_v9  ;;  %250 = vmatprep.subr.mxu1 %v1712_v10  ;;  %v1740_v18 = vld [vmem:[#allocation4 + $0x20] sm:$0xff]  ;;  %v34_v19 = vld [vmem:[%s2058_s0 + $0x10] sm:$0xff]  ;;  %v1747_v20 = vld [vmem:[#allocation4 + $0x18] sm:$0xff] }
  0x15   :  { %251 = vmatpush1.msra.mxu1 %v1714_v11  ;;  %151 = vmatprep.mubr.f32.mxu0 %v1650_v0  ;;  %v1750_v21 = vld [vmem:[#allocation4 + $0x10] sm:$0xff]  ;;  %v1754_v22 = vld [vmem:[#allocation4 + $0x8] sm:$0xff]  ;;  %v1759_v23 = vld [vmem:[#allocation4] sm:$0xff]  ;;  %p1630_p8 = por %p1629_p7, %p1628_p6 }
  0x16   :  { %252 = vmatprep.subr.mxu1 %v1717_v12  ;;  %556 = vmatprep.subr.mxu0 %v1689_v2  ;;  %v35_v24 = vld [vmem:[%s2058_s0 + $0x18] sm:$0xff]  ;;  %v36_v25 = vld [vmem:[%s2058_s0 + $0x20] sm:$0xff]  ;;  %v37_v26 = vld [vmem:[%s2058_s0 + $0x28] sm:$0xff] }
  0x17   :  { %253 = vmatpush1.msra.mxu1 %v1721_v13  ;;  %557 = vmatpush1.msra.mxu0 %v1695_v4  ;;  %v38_v27 = vld [vmem:[%s2058_s0 + $0x30] sm:$0xff]  ;;  %v39_v28 = vld [vmem:[%s2058_s0 + $0x38] sm:$0xff]  ;;  %v44_v32 = vld [vmem:[%s2061_s3] sm:$0x3]  ;;  %s1651_s3 = smov 64   ;;  %p1631_p9 = pnand %p1630_p8, %p1624_p5 }
  0x18   :  { %1484 = vmatmul.mubr.msk.f32.gmra.mxu0 %vm56_vm0, %v33_v14  ;;  %254 = vmatprep.subr.mxu1 %v1728_v15  ;;  %v53_v34 = vrot.slane %v44_v32, %v52_v31  ;;  %v49_v37 = vrot.slane %v44_v32, %v48_v33 }
  0x19   :  { %255 = vmatpush1.msra.mxu1 %v1731_v16  ;;  %157 = vmatprep.mubr.f32.mxu0 %v1650_v0 }
  0x1a   :  { %256 = vmatprep.subr.mxu1 %v1735_v17  ;;  %558 = vmatprep.subr.mxu0 %v1700_v6 }
  0x1b   :  { %257 = vmatpush1.msra.mxu1 %v1740_v18  ;;  %559 = vmatpush1.msra.mxu0 %v1706_v8 }
  0x1c   :  { %1485 = vmatmul.mubr.msk.f32.gmra.mxu0 %vm56_vm0, %v34_v19  ;;  %258 = vmatprep.subr.mxu1 %v1747_v20 }
  0x1d   :  { %259 = vmatpush1.msra.mxu1 %v1750_v21  ;;  %163 = vmatprep.mubr.f32.mxu0 %v1650_v0 }
  0x1e   :  { %260 = vmatprep.subr.mxu1 %v1754_v22  ;;  %560 = vmatprep.subr.mxu0 %v1712_v10 }
  0x1f   :  { %261 = vmatpush1.msra.mxu1 %v1759_v23  ;;  %561 = vmatpush1.msra.mxu0 %v1714_v11 }
  0x20   :  { %1486 = vmatmul.mubr.msk.f32.gmra.mxu0 %vm56_vm0, %v35_v24  ;;  %295 = vmatmul.mubr.f32.vlgmr.msra.gmra.mxu1 %v1650_v0 }
  0x21   :  { %169 = vmatprep.mubr.f32.mxu0 %v1650_v0  ;;  %401 = vmatprep.subr.mxu1 %v1689_v2 }
  0x22   :  { %402 = vmatpush1.msra.mxu1 %v1695_v4  ;;  %449 = vmatprep.mubr.f32.mxu1 %v1650_v0 }
  0x23   :  { %403 = vmatprep.subr.mxu1 %v1700_v6  ;;  %562 = vmatprep.subr.mxu0 %v1717_v12 }
  0x24   :  { %1487 = vmatmul.mubr.msk.f32.gmra.mxu0 %vm56_vm0, %v36_v25  ;;  %404 = vmatpush1.msra.mxu1 %v1706_v8 }
  0x25   :  { %175 = vmatprep.mubr.f32.mxu0 %v1650_v0  ;;  %405 = vmatprep.subr.mxu1 %v1712_v10 }
  0x26   :  { %406 = vmatpush1.msra.mxu1 %v1714_v11  ;;  %563 = vmatpush1.msra.mxu0 %v1721_v13 }
  0x27   :  { %407 = vmatprep.subr.mxu1 %v1717_v12  ;;  %564 = vmatprep.subr.mxu0 %v1728_v15 }
  0x28   :  { %1488 = vmatmul.mubr.msk.f32.gmra.mxu0 %vm56_vm0, %v37_v26  ;;  %408 = vmatpush1.msra.mxu1 %v1721_v13 }
  0x29   :  { %181 = vmatprep.mubr.f32.mxu0 %v1650_v0  ;;  %409 = vmatprep.subr.mxu1 %v1728_v15 }
  0x2a   :  { %410 = vmatpush1.msra.mxu1 %v1731_v16  ;;  %565 = vmatpush1.msra.mxu0 %v1731_v16 }
  0x2b   :  { %411 = vmatprep.subr.mxu1 %v1735_v17  ;;  %566 = vmatprep.subr.mxu0 %v1735_v17 }
  0x2c   :  { %1489 = vmatmul.mubr.msk.f32.gmra.mxu0 %vm56_vm0, %v38_v27  ;;  %412 = vmatpush1.msra.mxu1 %v1740_v18 }
  0x2d   :  { %187 = vmatprep.mubr.f32.mxu0 %v1650_v0  ;;  %413 = vmatprep.subr.mxu1 %v1747_v20 }
  0x2e   :  { %414 = vmatpush1.msra.mxu1 %v1750_v21  ;;  %567 = vmatpush1.msra.mxu0 %v1740_v18 }
  0x2f   :  { %415 = vmatprep.subr.mxu1 %v1754_v22  ;;  %568 = vmatprep.subr.mxu0 %v1747_v20 }
  0x30   :  { %1490 = vmatmul.mubr.msk.f32.gmra.mxu0 %vm56_vm0, %v39_v28  ;;  %416 = vmatpush1.msra.mxu1 %v1759_v23 }
  0x31   :  { %569 = vmatpush1.msra.mxu0 %v1750_v21  ;;  %604 = vmatprep.mubr.f32.mxu0 %v1650_v0 }
  0x32   :  { %570 = vmatprep.subr.mxu0 %v1754_v22  ;;  %711 = vmatprep.subr.mxu1 %v1689_v2 }
  0x33   :  { %571 = vmatpush1.msra.mxu0 %v1759_v23 }
  0x34   :  { %866 = vmatprep.subr.mxu0 %v1689_v2 }
  0xd4   :  { %v147_v35 = vpop.f32.mrf.mxu0 }
  0xd5   :  { %v148_v46 = vadd.f32 %v147_v35, %v49_v37 }
  0xd6   :  { %v149_v36 = vpop.f32.mrf.mxu0 }
  0xd7   :  { %v1825_v38 = vadd.f32 %v149_v36, %v53_v34 }
  0xd8   :  { %v153_v39 = vpop.f32.mrf.mxu0 }
  0xd9   :  { %v1827_v40 = vadd.f32 %v153_v39, %v49_v37 }
  0xda   :  { %v155_v41 = vpop.f32.mrf.mxu0 }
  0xdb   :  { %v1829_v42 = vadd.f32 %v155_v41, %v53_v34 }
  0xdc   :  { %v159_v43 = vpop.f32.mrf.mxu0 }
  0xdd   :  { %v1831_v44 = vadd.f32 %v159_v43, %v49_v37 }
  0xde   :  { %v161_v45 = vpop.f32.mrf.mxu0 }
  0xdf   :  { %v1833_v47 = vadd.f32 %v161_v45, %v53_v34 }
  0xe0   :  { %v165_v48 = vpop.f32.mrf.mxu0  ;;  %v296_v49 = vpop.f32.mrf.mxu1 }
  0xe1   :  { %v1835_v50 = vadd.f32 %v165_v48, %v49_v37  ;;  %v305_v51 = vadd.f32 %v296_v49, %v148_v46 }
  0xe2   :  { %v167_v52 = vpop.f32.mrf.mxu0  ;;  %v298_v24 = vpop.f32.mrf.mxu1 }
  0xe3   :  { %1507 = vtanh.f32 %v305_v51  ;;  %v1837_v53 = vadd.f32 %v167_v52, %v53_v34  ;;  %v311_v27 = vmul.f32 0.5, %v305_v51 }
  0xe4   :  { %v171_v54 = vpop.f32.mrf.mxu0 }
  0xe5   :  { %v1839_v55 = vadd.f32 %v171_v54, %v49_v37 }
  0xe6   :  { %v173_v56 = vpop.f32.mrf.mxu0 }
  0xe7   :  { %v1841_v57 = vadd.f32 %v173_v56, %v53_v34 }
  0xe8   :  { %v177_v58 = vpop.f32.mrf.mxu0 }
  0xe9   :  { %v1843_v59 = vadd.f32 %v177_v58, %v49_v37 }
  0xea   :  { %v179_v60 = vpop.f32.mrf.mxu0 }
  0xeb   :  { %v1845_v61 = vadd.f32 %v179_v60, %v53_v34 }
  0xec   :  { %v183_v62 = vpop.f32.mrf.mxu0 }
  0xed   :  { %v1847_v63 = vadd.f32 %v183_v62, %v49_v37 }
  0xee   :  { %v185_v1 = vpop.f32.mrf.mxu0 }
  0xef   :  { %v1849_v3 = vadd.f32 %v185_v1, %v53_v34 }
  0xf0   :  { %v1508_v5 = vpop.eup %1507  ;;  %v189_v7 = vpop.f32.mrf.mxu0 }
  0xf1   :  { %v1851_v9 = vadd.f32 %v189_v7, %v49_v37  ;;  %318 = vrot.lane.b32.xlu0 %v1508_v5, %s1651_s3 }
  0xf2   :  { %v191_v14 = vpop.f32.mrf.mxu0 }
  0xf3   :  { %v192_v19 = vadd.f32 %v191_v14, %v53_v34 }
  0xf5   :  { %v310_v25 = vadd.f32 %v298_v24, %v192_v19 }
  0xf7   :  { %1509 = vtanh.f32 %v310_v25  ;;  %v333_v29 = vmul.f32 0.5, %v310_v25 }
  0xf8   :  { %1511 = vtanh.f32 %v311_v27 }
  0xf9   :  { %1513 = vtanh.f32 %v333_v29 }
 0x104   :  { %v1510_v26 = vpop.eup %1509 }
 0x105   :  { %340 = vrot.lane.b32.xlu0 %v1510_v26, %s1651_s3  ;;  %v1512_v28 = vpop.eup %1511 }
 0x106   :  { %v313_v30 = vmul.f32 0.5, %v1512_v28  ;;  %v1514_v35 = vpop.eup %1513 }
 0x107   :  { %v335_v34 = vmul.f32 0.5, %v1514_v35 }
 0x108   :  { %v314_v31 = vadd.f32 0.5, %v313_v30 }
 0x109   :  { %v336_v36 = vadd.f32 0.5, %v335_v34 }
 0x10a   :  { %v316_v41 = vmul.f32 0.0, %v314_v31 }
 0x10b   :  { %v338_v48 = vmul.f32 0.0, %v336_v36 }
 0x163   :  { %v319_v32 = vpop.permute.xlu0 %318 }
 0x164   :  { %v321_v33 = vmul.f32 %v319_v32, %v314_v31 }
 0x166   :  { %323 = vrot.lane.b32.xlu1 %v321_v33, %s1652_s19 }
 0x177   :  { %v341_v37 = vpop.permute.xlu0 %340 }
 0x178   :  { %v343_v39 = vmul.f32 %v341_v37, %v336_v36 }
 0x17a   :  { %345 = vrot.lane.b32.xlu1 %v343_v39, %s1652_s19 }
 0x1d8   :  { %v324_v43 = vpop.permute.xlu1 %323 }
 0x1d9   :  { %v1857_v45 = vadd.f32 %v324_v43, %v316_v41 }
 0x1db   :  { %1515 = vtanh.f32 %v1857_v45 }
 0x1e8   :  { %v1516_v46 = vpop.eup %1515 }
 0x1e9   :  { %329 = vrot.lane.b32.xlu0 %v1516_v46, %s1651_s3 }
 0x1ec   :  { %v346_v49 = vpop.permute.xlu1 %345 }
 0x1ed   :  { %v1861_v51 = vadd.f32 %v346_v49, %v338_v48 }
 0x1ef   :  { %1517 = vtanh.f32 %v1861_v51 }
 0x1fc   :  { %v1518_v52 = vpop.eup %1517 }
 0x1fd   :  { %351 = vrot.lane.b32.xlu1 %v1518_v52, %s1651_s3 }
 0x25b   :  { %v330_v54 = vpop.permute.xlu0 %329 }
 0x25c   :  { %v332_v56 = vmul.f32 %v330_v54, %v314_v31 }
 0x25e   :  { %356 = vrot.lane.b32.xlu0 %v332_v56, %s1652_s19 }
 0x26f   :  { %v352_v58 = vpop.permute.xlu1 %351 }
 0x270   :  { %v354_v60 = vmul.f32 %v352_v58, %v336_v36 }
 0x272   :  { %360 = vrot.lane.b32.xlu1 %v354_v60, %s1651_s3 }
 0x2d0   :  { %v357_v62 = vpop.permute.xlu0 %356 }
 0x2e4   :  { %v361_v1 = vpop.permute.xlu1 %360 }
 0x2e5   :  { %v364_v5 = vsel %vm363_vm1, %v357_v62, %v361_v1 }
 0x2e6   :  { %365 = vst.msk [vmem:[#allocation3] sm:$0xff] %vm226_vm2, %v364_v5  ;;  %1491 = vmatmul.mubr.msk.f32.vlgmr.msra.gmra.mxu1 %vm226_vm2, %v364_v5 }
 0x2e7   :  { %712 = vmatpush1.msra.mxu1 %v1695_v4  ;;  %759 = vmatprep.mubr.f32.mxu1 %v1650_v0 }
 0x2e8   :  { %713 = vmatprep.subr.mxu1 %v1700_v6 }
 0x2e9   :  { %714 = vmatpush1.msra.mxu1 %v1706_v8 }
 0x2ea   :  { %715 = vmatprep.subr.mxu1 %v1712_v10 }
 0x2eb   :  { %716 = vmatpush1.msra.mxu1 %v1714_v11 }
 0x2ec   :  { %717 = vmatprep.subr.mxu1 %v1717_v12 }
 0x2ed   :  { %718 = vmatpush1.msra.mxu1 %v1721_v13 }
 0x2ee   :  { %719 = vmatprep.subr.mxu1 %v1728_v15 }
 0x2ef   :  { %720 = vmatpush1.msra.mxu1 %v1731_v16 }
 0x2f0   :  { %721 = vmatprep.subr.mxu1 %v1735_v17 }
 0x2f1   :  { %722 = vmatpush1.msra.mxu1 %v1740_v18 }
 0x2f2   :  { %723 = vmatprep.subr.mxu1 %v1747_v20 }
 0x2f3   :  { %724 = vmatpush1.msra.mxu1 %v1750_v21 }
 0x2f4   :  { %725 = vmatprep.subr.mxu1 %v1754_v22 }
 0x2f5   :  { %726 = vmatpush1.msra.mxu1 %v1759_v23 }
 0x2f6   :  { %1015 = vmatprep.subr.mxu1 %v1689_v2 }
 0x3a6   :  { %v451_v7 = vpop.f32.mrf.mxu1 }
 0x3a7   :  { %v460_v14 = vadd.f32 %v451_v7, %v1827_v40 }
 0x3a8   :  { %v453_v19 = vpop.f32.mrf.mxu1 }
 0x3a9   :  { %1519 = vtanh.f32 %v460_v14  ;;  %v465_v24 = vadd.f32 %v453_v19, %v1849_v3  ;;  %v466_v27 = vmul.f32 0.5, %v460_v14 }
 0x3ab   :  { %1521 = vtanh.f32 %v465_v24  ;;  %v488_v28 = vmul.f32 0.5, %v465_v24 }
 0x3ac   :  { %1523 = vtanh.f32 %v466_v27 }
 0x3ad   :  { %1525 = vtanh.f32 %v488_v28 }
 0x3b6   :  { %v1520_v25 = vpop.eup %1519 }
 0x3b7   :  { %473 = vrot.lane.b32.xlu0 %v1520_v25, %s1651_s3 }
 0x3b8   :  { %v1522_v26 = vpop.eup %1521 }
 0x3b9   :  { %495 = vrot.lane.b32.xlu1 %v1522_v26, %s1651_s3  ;;  %v1524_v29 = vpop.eup %1523 }
 0x3ba   :  { %v1526_v2 = vpop.eup %1525  ;;  %v468_v30 = vmul.f32 0.5, %v1524_v29 }
 0x3bb   :  { %v490_v31 = vmul.f32 0.5, %v1526_v2 }
 0x3bc   :  { %v469_v40 = vadd.f32 0.5, %v468_v30 }
 0x3bd   :  { %v491_v35 = vadd.f32 0.5, %v490_v31 }
 0x3be   :  { %v471_v36 = vmul.f32 %v469_v40, %v1857_v45 }
 0x3bf   :  { %v493_v41 = vmul.f32 %v491_v35, %v1861_v51 }
 0x429   :  { %v474_v32 = vpop.permute.xlu0 %473 }
 0x42a   :  { %v476_v33 = vmul.f32 %v474_v32, %v469_v40 }
 0x42b   :  { %v496_v3 = vpop.permute.xlu1 %495 }
 0x42c   :  { %478 = vrot.lane.b32.xlu0 %v476_v33, %s1652_s19  ;;  %v498_v34 = vmul.f32 %v496_v3, %v491_v35 }
 0x42e   :  { %500 = vrot.lane.b32.xlu1 %v498_v34, %s1652_s19 }
 0x49e   :  { %v479_v37 = vpop.permute.xlu0 %478 }
 0x49f   :  { %v1894_v39 = vadd.f32 %v479_v37, %v471_v36 }
 0x4a0   :  { %v501_v43 = vpop.permute.xlu1 %500 }
 0x4a1   :  { %1527 = vtanh.f32 %v1894_v39  ;;  %v503_v46 = vadd.f32 %v501_v43, %v493_v41 }
 0x4a3   :  { %1529 = vtanh.f32 %v503_v46 }
 0x4ae   :  { %v1528_v48 = vpop.eup %1527 }
 0x4af   :  { %484 = vrot.lane.b32.xlu0 %v1528_v48, %s1651_s3 }
 0x4b0   :  { %v1530_v49 = vpop.eup %1529 }
 0x4b1   :  { %506 = vrot.lane.b32.xlu1 %v1530_v49, %s1651_s3 }
 0x521   :  { %v485_v52 = vpop.permute.xlu0 %484 }
 0x522   :  { %v487_v54 = vmul.f32 %v485_v52, %v469_v40 }
 0x523   :  { %v507_v56 = vpop.permute.xlu1 %506 }
 0x524   :  { %511 = vrot.lane.b32.xlu0 %v487_v54, %s1652_s19  ;;  %v509_v45 = vmul.f32 %v507_v56, %v491_v35 }
 0x526   :  { %515 = vrot.lane.b32.xlu1 %v509_v45, %s1651_s3 }
 0x596   :  { %v512_v51 = vpop.permute.xlu0 %511 }
 0x598   :  { %v516_v58 = vpop.permute.xlu1 %515 }
 0x599   :  { %v518_v60 = vsel %vm363_vm1, %v512_v51, %v516_v58 }
 0x59a   :  { %520 = vst.msk [vmem:[#allocation3 + $0x8] sm:$0xff] %vm226_vm2, %v518_v60  ;;  %1492 = vmatmul.mubr.msk.f32.vlgmr.msra.gmra.mxu0 %vm226_vm2, %v518_v60 }
 0x59b   :  { %867 = vmatpush1.msra.mxu0 %v1695_v4  ;;  %914 = vmatprep.mubr.f32.mxu0 %v1650_v0 }
 0x59c   :  { %868 = vmatprep.subr.mxu0 %v1700_v6 }
 0x59d   :  { %869 = vmatpush1.msra.mxu0 %v1706_v8 }
 0x59e   :  { %870 = vmatprep.subr.mxu0 %v1712_v10 }
 0x59f   :  { %871 = vmatpush1.msra.mxu0 %v1714_v11 }
 0x5a0   :  { %872 = vmatprep.subr.mxu0 %v1717_v12 }
 0x5a1   :  { %873 = vmatpush1.msra.mxu0 %v1721_v13 }
 0x5a2   :  { %874 = vmatprep.subr.mxu0 %v1728_v15 }
 0x5a3   :  { %875 = vmatpush1.msra.mxu0 %v1731_v16 }
 0x5a4   :  { %876 = vmatprep.subr.mxu0 %v1735_v17 }
 0x5a5   :  { %877 = vmatpush1.msra.mxu0 %v1740_v18 }
 0x5a6   :  { %878 = vmatprep.subr.mxu0 %v1747_v20 }
 0x5a7   :  { %879 = vmatpush1.msra.mxu0 %v1750_v21 }
 0x5a8   :  { %880 = vmatprep.subr.mxu0 %v1754_v22 }
 0x5a9   :  { %881 = vmatpush1.msra.mxu0 %v1759_v23 }
 0x65a   :  { %v606_v62 = vpop.f32.mrf.mxu0 }
 0x65b   :  { %v615_v1 = vadd.f32 %v606_v62, %v1831_v44 }
 0x65c   :  { %v608_v5 = vpop.f32.mrf.mxu0 }
 0x65d   :  { %1531 = vtanh.f32 %v615_v1  ;;  %v620_v7 = vadd.f32 %v608_v5, %v1845_v61  ;;  %v621_v24 = vmul.f32 0.5, %v615_v1 }
 0x65f   :  { %1533 = vtanh.f32 %v620_v7  ;;  %v643_v25 = vmul.f32 0.5, %v620_v7 }
 0x660   :  { %1535 = vtanh.f32 %v621_v24 }
 0x661   :  { %1537 = vtanh.f32 %v643_v25 }
 0x66a   :  { %v1532_v14 = vpop.eup %1531 }
 0x66b   :  { %628 = vrot.lane.b32.xlu0 %v1532_v14, %s1651_s3 }
 0x66c   :  { %v1534_v19 = vpop.eup %1533 }
 0x66d   :  { %650 = vrot.lane.b32.xlu1 %v1534_v19, %s1651_s3  ;;  %v1536_v26 = vpop.eup %1535 }
 0x66e   :  { %v1538_v27 = vpop.eup %1537  ;;  %v623_v28 = vmul.f32 0.5, %v1536_v26 }
 0x66f   :  { %v645_v29 = vmul.f32 0.5, %v1538_v27 }
 0x670   :  { %v624_v44 = vadd.f32 0.5, %v623_v28 }
 0x671   :  { %v646_v31 = vadd.f32 0.5, %v645_v29 }
 0x672   :  { %v626_v32 = vmul.f32 %v624_v44, %v1894_v39 }
 0x673   :  { %v648_v3 = vmul.f32 %v646_v31, %v503_v46 }
 0x6dd   :  { %v629_v2 = vpop.permute.xlu0 %628 }
 0x6de   :  { %v631_v30 = vmul.f32 %v629_v2, %v624_v44 }
 0x6df   :  { %v651_v61 = vpop.permute.xlu1 %650 }
 0x6e0   :  { %633 = vrot.lane.b32.xlu0 %v631_v30, %s1652_s19  ;;  %v653_v40 = vmul.f32 %v651_v61, %v646_v31 }
 0x6e2   :  { %655 = vrot.lane.b32.xlu1 %v653_v40, %s1652_s19 }
 0x752   :  { %v634_v33 = vpop.permute.xlu0 %633 }
 0x753   :  { %v1928_v35 = vadd.f32 %v634_v33, %v626_v32 }
 0x754   :  { %v656_v34 = vpop.permute.xlu1 %655 }
 0x755   :  { %1539 = vtanh.f32 %v1928_v35  ;;  %v658_v36 = vadd.f32 %v656_v34, %v648_v3 }
 0x757   :  { %1541 = vtanh.f32 %v658_v36 }
 0x762   :  { %v1540_v37 = vpop.eup %1539 }
 0x763   :  { %639 = vrot.lane.b32.xlu0 %v1540_v37, %s1651_s3 }
 0x764   :  { %v1542_v41 = vpop.eup %1541 }
 0x765   :  { %661 = vrot.lane.b32.xlu1 %v1542_v41, %s1651_s3 }
 0x7d5   :  { %v640_v43 = vpop.permute.xlu0 %639 }
 0x7d6   :  { %v642_v48 = vmul.f32 %v640_v43, %v624_v44 }
 0x7d7   :  { %v662_v49 = vpop.permute.xlu1 %661 }
 0x7d8   :  { %666 = vrot.lane.b32.xlu0 %v642_v48, %s1652_s19  ;;  %v664_v39 = vmul.f32 %v662_v49, %v646_v31 }
 0x7da   :  { %670 = vrot.lane.b32.xlu1 %v664_v39, %s1651_s3 }
 0x84a   :  { %v667_v46 = vpop.permute.xlu0 %666 }
 0x84c   :  { %v671_v52 = vpop.permute.xlu1 %670 }
 0x84d   :  { %v673_v54 = vsel %vm363_vm1, %v667_v46, %v671_v52 }
 0x84e   :  { %675 = vst.msk [vmem:[#allocation3 + $0x10] sm:$0xff] %vm226_vm2, %v673_v54  ;;  %1493 = vmatmul.mubr.msk.f32.vlgmr.msra.gmra.mxu1 %vm226_vm2, %v673_v54 }
 0x84f   :  { %1016 = vmatpush1.msra.mxu1 %v1695_v4  ;;  %1063 = vmatprep.mubr.f32.mxu1 %v1650_v0 }
 0x850   :  { %1017 = vmatprep.subr.mxu1 %v1700_v6 }
 0x851   :  { %1018 = vmatpush1.msra.mxu1 %v1706_v8 }
 0x852   :  { %1019 = vmatprep.subr.mxu1 %v1712_v10 }
 0x853   :  { %1020 = vmatpush1.msra.mxu1 %v1714_v11 }
 0x854   :  { %1021 = vmatprep.subr.mxu1 %v1717_v12 }
 0x855   :  { %1022 = vmatpush1.msra.mxu1 %v1721_v13 }
 0x856   :  { %1023 = vmatprep.subr.mxu1 %v1728_v15 }
 0x857   :  { %1024 = vmatpush1.msra.mxu1 %v1731_v16 }
 0x858   :  { %1025 = vmatprep.subr.mxu1 %v1735_v17 }
 0x859   :  { %1026 = vmatpush1.msra.mxu1 %v1740_v18 }
 0x85a   :  { %1027 = vmatprep.subr.mxu1 %v1747_v20 }
 0x85b   :  { %1028 = vmatpush1.msra.mxu1 %v1750_v21 }
 0x85c   :  { %1029 = vmatprep.subr.mxu1 %v1754_v22 }
 0x85d   :  { %1030 = vmatpush1.msra.mxu1 %v1759_v23 }
 0x90e   :  { %v761_v4 = vpop.f32.mrf.mxu1 }
 0x90f   :  { %v770_v6 = vadd.f32 %v761_v4, %v1835_v50 }
 0x910   :  { %v763_v8 = vpop.f32.mrf.mxu1 }
 0x911   :  { %1543 = vtanh.f32 %v770_v6  ;;  %v775_v10 = vadd.f32 %v763_v8, %v1841_v57  ;;  %v776_v13 = vmul.f32 0.5, %v770_v6 }
 0x913   :  { %1545 = vtanh.f32 %v775_v10  ;;  %v798_v15 = vmul.f32 0.5, %v775_v10 }
 0x914   :  { %1547 = vtanh.f32 %v776_v13 }
 0x915   :  { %1549 = vtanh.f32 %v798_v15 }
 0x91e   :  { %v1544_v11 = vpop.eup %1543 }
 0x91f   :  { %783 = vrot.lane.b32.xlu0 %v1544_v11, %s1651_s3 }
 0x920   :  { %v1546_v12 = vpop.eup %1545 }
 0x921   :  { %805 = vrot.lane.b32.xlu1 %v1546_v12, %s1651_s3  ;;  %v1548_v16 = vpop.eup %1547 }
 0x922   :  { %v1550_v17 = vpop.eup %1549  ;;  %v778_v18 = vmul.f32 0.5, %v1548_v16 }
 0x923   :  { %v800_v20 = vmul.f32 0.5, %v1550_v17 }
 0x924   :  { %v779_v21 = vadd.f32 0.5, %v778_v18 }
 0x925   :  { %v801_v50 = vadd.f32 0.5, %v800_v20 }
 0x926   :  { %v781_v45 = vmul.f32 %v779_v21, %v1928_v35 }
 0x927   :  { %v803_v60 = vmul.f32 %v801_v50, %v658_v36 }
 0x991   :  { %v784_v22 = vpop.permute.xlu0 %783 }
 0x992   :  { %v786_v23 = vmul.f32 %v784_v22, %v779_v21 }
 0x993   :  { %v806_v57 = vpop.permute.xlu1 %805 }
 0x994   :  { %788 = vrot.lane.b32.xlu0 %v786_v23, %s1652_s19  ;;  %v808_v56 = vmul.f32 %v806_v57, %v801_v50 }
 0x996   :  { %810 = vrot.lane.b32.xlu1 %v808_v56, %s1652_s19 }
 0xa06   :  { %v789_v51 = vpop.permute.xlu0 %788 }
 0xa07   :  { %v791_v58 = vadd.f32 %v789_v51, %v781_v45 }
 0xa08   :  { %v811_v62 = vpop.permute.xlu1 %810 }
 0xa09   :  { %1551 = vtanh.f32 %v791_v58  ;;  %v813_v1 = vadd.f32 %v811_v62, %v803_v60 }
 0xa0b   :  { %1553 = vtanh.f32 %v813_v1 }
 0xa16   :  { %v1552_v5 = vpop.eup %1551 }
 0xa17   :  { %794 = vrot.lane.b32.xlu0 %v1552_v5, %s1651_s3 }
 0xa18   :  { %v1554_v7 = vpop.eup %1553 }
 0xa19   :  { %816 = vrot.lane.b32.xlu1 %v1554_v7, %s1651_s3 }
 0xa89   :  { %v795_v14 = vpop.permute.xlu0 %794 }
 0xa8a   :  { %v797_v19 = vmul.f32 %v795_v14, %v779_v21 }
 0xa8b   :  { %v817_v24 = vpop.permute.xlu1 %816 }
 0xa8c   :  { %821 = vrot.lane.b32.xlu0 %v797_v19, %s1652_s19  ;;  %v819_v25 = vmul.f32 %v817_v24, %v801_v50 }
 0xa8e   :  { %825 = vrot.lane.b32.xlu1 %v819_v25, %s1651_s3 }
 0xafe   :  { %v822_v26 = vpop.permute.xlu0 %821 }
 0xb00   :  { %v826_v27 = vpop.permute.xlu1 %825 }
 0xb01   :  { %v828_v28 = vsel %vm363_vm1, %v822_v26, %v826_v27 }
 0xb02   :  { %830 = vst.msk [vmem:[#allocation3 + $0x18] sm:$0xff] %vm226_vm2, %v828_v28  ;;  %1494 = vmatmul.mubr.msk.f32.vlgmr.msra.gmra.mxu0 %vm226_vm2, %v828_v28 }
 0xb03   :  { %1212 = vmatprep.mubr.f32.mxu0 %v1650_v0 }
 0xb09   :  { %v1439_v17 = vld [vmem:[#allocation3 + $0x18] sm:$0xff] }
 0xbc2   :  { %v916_v29 = vpop.f32.mrf.mxu0 }
 0xbc3   :  { %v922_v44 = vadd.f32 %v916_v29, %v1839_v55 }
 0xbc4   :  { %v918_v2 = vpop.f32.mrf.mxu0 }
 0xbc5   :  { %1555 = vtanh.f32 %v922_v44  ;;  %v924_v30 = vadd.f32 %v918_v2, %v1837_v53  ;;  %v925_v40 = vmul.f32 0.5, %v922_v44  ;;  %v1144_v44 = vld [vmem:[#allocation4 + $0x78] sm:$0xff]  ;;  %v1143_v2 = vld [vmem:[#allocation4 + $0x70] sm:$0xff] }
 0xbc6   :  { %1164 = vmatprep.subr.mxu0 %v1144_v44  ;;  %1313 = vmatprep.subr.mxu1 %v1144_v44  ;;  %v1431_v44 = vld [vmem:[#allocation3 + $0x8] sm:$0xff] }
 0xbc7   :  { %1557 = vtanh.f32 %v924_v30  ;;  %v947_v32 = vmul.f32 0.5, %v924_v30  ;;  %v1142_v30 = vld [vmem:[#allocation4 + $0x68] sm:$0xff]  ;;  %1165 = vmatpush1.msra.mxu0 %v1143_v2 }
 0xbc8   :  { %1559 = vtanh.f32 %v925_v40  ;;  %1166 = vmatprep.subr.mxu0 %v1142_v30  ;;  %v1139_v40 = vld [vmem:[#allocation4 + $0x50] sm:$0xff] }
 0xbc9   :  { %1561 = vtanh.f32 %v947_v32  ;;  %v1138_v32 = vld [vmem:[#allocation4 + $0x48] sm:$0xff] }
 0xbd2   :  { %v1556_v31 = vpop.eup %1555 }
 0xbd3   :  { %932 = vrot.lane.b32.xlu0 %v1556_v31, %s1651_s3  ;;  %v1141_v31 = vld [vmem:[#allocation4 + $0x60] sm:$0xff] }
 0xbd4   :  { %v1558_v61 = vpop.eup %1557  ;;  %1167 = vmatpush1.msra.mxu0 %v1141_v31 }
 0xbd5   :  { %954 = vrot.lane.b32.xlu1 %v1558_v61, %s1651_s3  ;;  %v1560_v33 = vpop.eup %1559  ;;  %v1140_v61 = vld [vmem:[#allocation4 + $0x58] sm:$0xff] }
 0xbd6   :  { %v1562_v35 = vpop.eup %1561  ;;  %v927_v3 = vmul.f32 0.5, %v1560_v33  ;;  %1168 = vmatprep.subr.mxu0 %v1140_v61  ;;  %v1137_v33 = vld [vmem:[#allocation4 + $0x40] sm:$0xff] }
 0xbd7   :  { %v949_v34 = vmul.f32 0.5, %v1562_v35  ;;  %1169 = vmatpush1.msra.mxu0 %v1139_v40  ;;  %v1136_v35 = vld [vmem:[#allocation4 + $0x38] sm:$0xff] }
 0xbd8   :  { %v928_v55 = vadd.f32 0.5, %v927_v3  ;;  %1170 = vmatprep.subr.mxu0 %v1138_v32 }
 0xbd9   :  { %v950_v41 = vadd.f32 0.5, %v949_v34  ;;  %v1135_v34 = vld [vmem:[#allocation4 + $0x30] sm:$0xff]  ;;  %1171 = vmatpush1.msra.mxu0 %v1137_v33 }
 0xbda   :  { %v930_v48 = vmul.f32 %v928_v55, %v791_v58  ;;  %1172 = vmatprep.subr.mxu0 %v1136_v35 }
 0xbdb   :  { %v952_v46 = vmul.f32 %v950_v41, %v813_v1  ;;  %1173 = vmatpush1.msra.mxu0 %v1135_v34 }
 0xc45   :  { %v933_v36 = vpop.permute.xlu0 %932 }
 0xc46   :  { %v935_v37 = vmul.f32 %v933_v36, %v928_v55  ;;  %v1133_v36 = vld [vmem:[#allocation4 + $0x20] sm:$0xff] }
 0xc47   :  { %v955_v53 = vpop.permute.xlu1 %954 }
 0xc48   :  { %937 = vrot.lane.b32.xlu0 %v935_v37, %s1652_s19  ;;  %v957_v43 = vmul.f32 %v955_v53, %v950_v41  ;;  %v1131_v53 = vld [vmem:[#allocation4 + $0x10] sm:$0xff] }
 0xc4a   :  { %959 = vrot.lane.b32.xlu1 %v957_v43, %s1652_s19  ;;  %v1130_v43 = vld [vmem:[#allocation4 + $0x8] sm:$0xff] }
 0xcba   :  { %v938_v49 = vpop.permute.xlu0 %937 }
 0xcbb   :  { %v940_v39 = vadd.f32 %v938_v49, %v930_v48  ;;  %v1129_v48 = vld [vmem:[#allocation4] sm:$0xff] }
 0xcbc   :  { %v960_v52 = vpop.permute.xlu1 %959 }
 0xcbd   :  { %1563 = vtanh.f32 %v940_v39  ;;  %v962_v54 = vadd.f32 %v960_v52, %v952_v46 }
 0xcbf   :  { %1565 = vtanh.f32 %v962_v54 }
 0xcca   :  { %v1564_v4 = vpop.eup %1563 }
 0xccb   :  { %943 = vrot.lane.b32.xlu0 %v1564_v4, %s1651_s3 }
 0xccc   :  { %v1566_v6 = vpop.eup %1565 }
 0xccd   :  { %965 = vrot.lane.b32.xlu1 %v1566_v6, %s1651_s3 }
 0xd3d   :  { %v944_v8 = vpop.permute.xlu0 %943 }
 0xd3e   :  { %v946_v10 = vmul.f32 %v944_v8, %v928_v55  ;;  %v1134_v55 = vld [vmem:[#allocation4 + $0x28] sm:$0xff]  ;;  %v1435_v8 = vld [vmem:[#allocation3 + $0x10] sm:$0xff] }
 0xd3f   :  { %v966_v11 = vpop.permute.xlu1 %965  ;;  %1174 = vmatprep.subr.mxu0 %v1134_v55 }
 0xd40   :  { %970 = vrot.lane.b32.xlu0 %v946_v10, %s1652_s19  ;;  %v968_v12 = vmul.f32 %v966_v11, %v950_v41  ;;  %v1132_v41 = vld [vmem:[#allocation4 + $0x18] sm:$0xff]  ;;  %1175 = vmatpush1.msra.mxu0 %v1133_v36 }
 0xd41   :  { %1176 = vmatprep.subr.mxu0 %v1132_v41 }
 0xd42   :  { %974 = vrot.lane.b32.xlu1 %v968_v12, %s1651_s3  ;;  %1177 = vmatpush1.msra.mxu0 %v1131_v53 }
 0xd43   :  { %1178 = vmatprep.subr.mxu0 %v1130_v43 }
 0xd44   :  { %1179 = vmatpush1.msra.mxu0 %v1129_v48 }
 0xdb2   :  { %v971_v13 = vpop.permute.xlu0 %970 }
 0xdb4   :  { %v975_v15 = vpop.permute.xlu1 %974 }
 0xdb5   :  { %v977_v16 = vsel %vm363_vm1, %v971_v13, %v975_v15 }
 0xdb6   :  { %979 = vst.msk [vmem:[#allocation3 + $0x20] sm:$0xff] %vm226_vm2, %v977_v16  ;;  %1495 = vmatmul.mubr.msk.f32.vlgmr.msra.gmra.mxu1 %vm226_vm2, %v977_v16 }
 0xdb7   :  { %1361 = vmatprep.mubr.f32.mxu1 %v1650_v0  ;;  %1314 = vmatpush1.msra.mxu1 %v1143_v2 }
 0xdb8   :  { %1315 = vmatprep.subr.mxu1 %v1142_v30 }
 0xdb9   :  { %1316 = vmatpush1.msra.mxu1 %v1141_v31 }
 0xdba   :  { %1317 = vmatprep.subr.mxu1 %v1140_v61 }
 0xdbb   :  { %1318 = vmatpush1.msra.mxu1 %v1139_v40 }
 0xdbc   :  { %1319 = vmatprep.subr.mxu1 %v1138_v32 }
 0xdbd   :  { %v1440_v18 = vld [vmem:[#allocation3 + $0x20] sm:$0xff]  ;;  %1320 = vmatpush1.msra.mxu1 %v1137_v33 }
 0xdbe   :  { %v1441_v20 = vsel %vm363_vm1, %v1439_v17, %v1440_v18  ;;  %v1445_v21 = vsel %vm363_vm1, %v1440_v18, %v1439_v17  ;;  %1321 = vmatprep.subr.mxu1 %v1136_v35 }
 0xdbf   :  { %1442 = vst.msk [vmem:[#allocation7 + $0x18] sm:$0xff] %vm226_vm2, %v1441_v20  ;;  %1446 = vst.msk [vmem:[#allocation7 + $0x20] sm:$0xff] %vm226_vm2, %v1445_v21  ;;  %1322 = vmatpush1.msra.mxu1 %v1135_v34 }
 0xdc0   :  { %1323 = vmatprep.subr.mxu1 %v1134_v55 }
 0xdc1   :  { %1324 = vmatpush1.msra.mxu1 %v1133_v36 }
 0xdc2   :  { %1325 = vmatprep.subr.mxu1 %v1132_v41 }
 0xdc3   :  { %1326 = vmatpush1.msra.mxu1 %v1131_v53 }
 0xdc4   :  { %1327 = vmatprep.subr.mxu1 %v1130_v43 }
 0xdc5   :  { %1328 = vmatpush1.msra.mxu1 %v1129_v48 }
 0xe76   :  { %v1065_v22 = vpop.f32.mrf.mxu1 }
 0xe77   :  { %v1071_v23 = vadd.f32 %v1065_v22, %v1843_v59 }
 0xe78   :  { %v1067_v50 = vpop.f32.mrf.mxu1 }
 0xe79   :  { %1567 = vtanh.f32 %v1071_v23  ;;  %v1073_v57 = vadd.f32 %v1067_v50, %v1833_v47  ;;  %v1074_v45 = vmul.f32 0.5, %v1071_v23 }
 0xe7b   :  { %1569 = vtanh.f32 %v1073_v57  ;;  %v1096_v51 = vmul.f32 0.5, %v1073_v57 }
 0xe7c   :  { %1571 = vtanh.f32 %v1074_v45 }
 0xe7d   :  { %1573 = vtanh.f32 %v1096_v51 }
 0xe86   :  { %v1568_v56 = vpop.eup %1567 }
 0xe87   :  { %1081 = vrot.lane.b32.xlu0 %v1568_v56, %s1651_s3 }
 0xe88   :  { %v1570_v0 = vpop.eup %1569 }
 0xe89   :  { %1103 = vrot.lane.b32.xlu1 %v1570_v0, %s1651_s3  ;;  %v1572_v58 = vpop.eup %1571 }
 0xe8a   :  { %v1574_v60 = vpop.eup %1573  ;;  %v1076_v62 = vmul.f32 0.5, %v1572_v58 }
 0xe8b   :  { %v1098_v1 = vmul.f32 0.5, %v1574_v60 }
 0xe8c   :  { %v1991_v59 = vadd.f32 0.5, %v1076_v62 }
 0xe8d   :  { %v1994_v7 = vadd.f32 0.5, %v1098_v1 }
 0xe8e   :  { %v1079_v24 = vmul.f32 %v1991_v59, %v940_v39 }
 0xe8f   :  { %v1101_v27 = vmul.f32 %v1994_v7, %v962_v54 }
 0xef9   :  { %v1082_v5 = vpop.permute.xlu0 %1081 }
 0xefa   :  { %v1084_v47 = vmul.f32 %v1082_v5, %v1991_v59 }
 0xefb   :  { %v1104_v14 = vpop.permute.xlu1 %1103 }
 0xefc   :  { %1086 = vrot.lane.b32.xlu0 %v1084_v47, %s1652_s19  ;;  %v1106_v19 = vmul.f32 %v1104_v14, %v1994_v7 }
 0xefe   :  { %1108 = vrot.lane.b32.xlu1 %v1106_v19, %s1652_s19 }
 0xf6e   :  { %v1087_v25 = vpop.permute.xlu0 %1086 }
 0xf6f   :  { %v2000_v26 = vadd.f32 %v1087_v25, %v1079_v24 }
 0xf70   :  { %v1109_v28 = vpop.permute.xlu1 %1108 }
 0xf71   :  { %1575 = vtanh.f32 %v2000_v26  ;;  %v2004_v29 = vadd.f32 %v1109_v28, %v1101_v27 }
 0xf73   :  { %1577 = vtanh.f32 %v2004_v29 }
 0xf7e   :  { %v1576_v3 = vpop.eup %1575 }
 0xf7f   :  { %1092 = vrot.lane.b32.xlu0 %v1576_v3, %s1651_s3 }
 0xf80   :  { %v1578_v37 = vpop.eup %1577 }
 0xf81   :  { %1114 = vrot.lane.b32.xlu1 %v1578_v37, %s1651_s3 }
 0xff1   :  { %v1093_v49 = vpop.permute.xlu0 %1092 }
 0xff2   :  { %v1095_v39 = vmul.f32 %v1093_v49, %v1991_v59 }
 0xff3   :  { %v1115_v46 = vpop.permute.xlu1 %1114 }
 0xff4   :  { %1119 = vrot.lane.b32.xlu0 %v1095_v39, %s1652_s19  ;;  %v1117_v52 = vmul.f32 %v1115_v46, %v1994_v7 }
 0xff6   :  { %1123 = vrot.lane.b32.xlu1 %v1117_v52, %s1651_s3 }
0x1066   :  { %v1120_v54 = vpop.permute.xlu0 %1119 }
0x1068   :  { %v1124_v4 = vpop.permute.xlu1 %1123 }
0x1069   :  { %v1126_v6 = vsel %vm363_vm1, %v1120_v54, %v1124_v4 }
0x106a   :  { %1128 = vst.msk [vmem:[#allocation3 + $0x28] sm:$0xff] %vm226_vm2, %v1126_v6  ;;  %1496 = vmatmul.mubr.msk.f32.vlgmr.msra.gmra.mxu0 %vm226_vm2, %v1126_v6 }
0x1071   :  { %v1436_v10 = vld [vmem:[#allocation3 + $0x28] sm:$0xff] }
0x1072   :  { %v1437_v11 = vsel %vm363_vm1, %v1435_v8, %v1436_v10  ;;  %v1449_v12 = vsel %vm363_vm1, %v1436_v10, %v1435_v8 }
0x1073   :  { %1438 = vst.msk [vmem:[#allocation7 + $0x10] sm:$0xff] %vm226_vm2, %v1437_v11  ;;  %1450 = vst.msk [vmem:[#allocation7 + $0x28] sm:$0xff] %vm226_vm2, %v1449_v12 }
0x112a   :  { %v1214_v13 = vpop.f32.mrf.mxu0 }
0x112b   :  { %v1220_v15 = vadd.f32 %v1214_v13, %v1847_v63 }
0x112c   :  { %v1216_v16 = vpop.f32.mrf.mxu0 }
0x112d   :  { %1579 = vtanh.f32 %v1220_v15  ;;  %v1222_v17 = vadd.f32 %v1216_v16, %v1829_v42  ;;  %v1223_v21 = vmul.f32 0.5, %v1220_v15 }
0x112f   :  { %1581 = vtanh.f32 %v1222_v17  ;;  %v1245_v22 = vmul.f32 0.5, %v1222_v17 }
0x1130   :  { %1583 = vtanh.f32 %v1223_v21  ;;  %v1427_v21 = vld [vmem:[#allocation3] sm:$0xff] }
0x1131   :  { %1585 = vtanh.f32 %v1245_v22 }
0x113a   :  { %v1580_v18 = vpop.eup %1579 }
0x113b   :  { %1230 = vrot.lane.b32.xlu0 %v1580_v18, %s1651_s3 }
0x113c   :  { %v1582_v20 = vpop.eup %1581 }
0x113d   :  { %1252 = vrot.lane.b32.xlu1 %v1582_v20, %s1651_s3  ;;  %v1584_v23 = vpop.eup %1583 }
0x113e   :  { %v1586_v50 = vpop.eup %1585  ;;  %v1225_v57 = vmul.f32 0.5, %v1584_v23 }
0x113f   :  { %v1247_v56 = vmul.f32 0.5, %v1586_v50 }
0x1140   :  { %v1226_v63 = vadd.f32 0.5, %v1225_v57 }
0x1141   :  { %v1248_v51 = vadd.f32 0.5, %v1247_v56 }
0x1142   :  { %v1228_v60 = vmul.f32 %v1226_v63, %v2000_v26 }
0x1143   :  { %v1250_v59 = vmul.f32 %v1248_v51, %v2004_v29 }
0x11ad   :  { %v1231_v0 = vpop.permute.xlu0 %1230 }
0x11ae   :  { %v1233_v45 = vmul.f32 %v1231_v0, %v1226_v63 }
0x11af   :  { %v1253_v42 = vpop.permute.xlu1 %1252 }
0x11b0   :  { %1235 = vrot.lane.b32.xlu0 %v1233_v45, %s1652_s19  ;;  %v1255_v58 = vmul.f32 %v1253_v42, %v1248_v51 }
0x11b2   :  { %1257 = vrot.lane.b32.xlu1 %v1255_v58, %s1652_s19 }
0x1222   :  { %v1236_v62 = vpop.permute.xlu0 %1235 }
0x1223   :  { %v1238_v1 = vadd.f32 %v1236_v62, %v1228_v60 }
0x1224   :  { %v1258_v5 = vpop.permute.xlu1 %1257 }
0x1225   :  { %1587 = vtanh.f32 %v1238_v1  ;;  %v1260_v47 = vadd.f32 %v1258_v5, %v1250_v59 }
0x1227   :  { %1589 = vtanh.f32 %v1260_v47 }
0x1232   :  { %v1588_v7 = vpop.eup %1587 }
0x1233   :  { %1241 = vrot.lane.b32.xlu0 %v1588_v7, %s1651_s3 }
0x1234   :  { %v1590_v14 = vpop.eup %1589 }
0x1235   :  { %1263 = vrot.lane.b32.xlu1 %v1590_v14, %s1651_s3 }
0x12a5   :  { %v1242_v19 = vpop.permute.xlu0 %1241 }
0x12a6   :  { %v1244_v24 = vmul.f32 %v1242_v19, %v1226_v63 }
0x12a7   :  { %v1264_v25 = vpop.permute.xlu1 %1263 }
0x12a8   :  { %1268 = vrot.lane.b32.xlu0 %v1244_v24, %s1652_s19  ;;  %v1266_v26 = vmul.f32 %v1264_v25, %v1248_v51 }
0x12aa   :  { %1272 = vrot.lane.b32.xlu1 %v1266_v26, %s1651_s3 }
0x131a   :  { %v1269_v27 = vpop.permute.xlu0 %1268 }
0x131c   :  { %v1273_v28 = vpop.permute.xlu1 %1272 }
0x131d   :  { %v1275_v29 = vsel %vm363_vm1, %v1269_v27, %v1273_v28 }
0x131e   :  { %1277 = vst.msk [vmem:[#allocation3 + $0x30] sm:$0xff] %vm226_vm2, %v1275_v29  ;;  %1497 = vmatmul.mubr.msk.f32.vlgmr.msra.gmra.mxu1 %vm226_vm2, %v1275_v29 }
0x1325   :  { %v1432_v2 = vld [vmem:[#allocation3 + $0x30] sm:$0xff] }
0x1326   :  { %v1433_v30 = vsel %vm363_vm1, %v1431_v44, %v1432_v2  ;;  %v1453_v31 = vsel %vm363_vm1, %v1432_v2, %v1431_v44 }
0x1327   :  { %1434 = vst.msk [vmem:[#allocation7 + $0x8] sm:$0xff] %vm226_vm2, %v1433_v30  ;;  %1454 = vst.msk [vmem:[#allocation7 + $0x30] sm:$0xff] %vm226_vm2, %v1453_v31 }
0x13de   :  { %v1363_v61 = vpop.f32.mrf.mxu1 }
0x13df   :  { %v1369_v40 = vadd.f32 %v1363_v61, %v1851_v9 }
0x13e0   :  { %v1365_v32 = vpop.f32.mrf.mxu1 }
0x13e1   :  { %1591 = vtanh.f32 %v1369_v40  ;;  %v1371_v33 = vadd.f32 %v1365_v32, %v1825_v38  ;;  %v1372_v34 = vmul.f32 0.5, %v1369_v40 }
0x13e3   :  { %1593 = vtanh.f32 %v1371_v33  ;;  %v1394_v55 = vmul.f32 0.5, %v1371_v33 }
0x13e4   :  { %1595 = vtanh.f32 %v1372_v34 }
0x13e5   :  { %1597 = vtanh.f32 %v1394_v55 }
0x13ee   :  { %v1592_v35 = vpop.eup %1591 }
0x13ef   :  { %1379 = vrot.lane.b32.xlu0 %v1592_v35, %s1651_s3 }
0x13f0   :  { %v1594_v3 = vpop.eup %1593 }
0x13f1   :  { %1401 = vrot.lane.b32.xlu1 %v1594_v3, %s1651_s3  ;;  %v1596_v36 = vpop.eup %1595 }
0x13f2   :  { %v1598_v37 = vpop.eup %1597  ;;  %v1374_v41 = vmul.f32 0.5, %v1596_v36 }
0x13f3   :  { %v1396_v53 = vmul.f32 0.5, %v1598_v37 }
0x13f4   :  { %v1375_v9 = vadd.f32 0.5, %v1374_v41 }
0x13f5   :  { %v1397_v49 = vadd.f32 0.5, %v1396_v53 }
0x13f6   :  { %v1377_v46 = vmul.f32 %v1375_v9, %v1238_v1 }
0x13f7   :  { %v1399_v4 = vmul.f32 %v1397_v49, %v1260_v47 }
0x1461   :  { %v1380_v43 = vpop.permute.xlu0 %1379 }
0x1462   :  { %v1382_v48 = vmul.f32 %v1380_v43, %v1375_v9 }
0x1463   :  { %v1402_v38 = vpop.permute.xlu1 %1401 }
0x1464   :  { %1384 = vrot.lane.b32.xlu0 %v1382_v48, %s1652_s19  ;;  %v1404_v39 = vmul.f32 %v1402_v38, %v1397_v49 }
0x1466   :  { %1406 = vrot.lane.b32.xlu1 %v1404_v39, %s1652_s19 }
0x14d6   :  { %v1385_v52 = vpop.permute.xlu0 %1384 }
0x14d7   :  { %v1387_v54 = vadd.f32 %v1385_v52, %v1377_v46 }
0x14d8   :  { %v1407_v6 = vpop.permute.xlu1 %1406 }
0x14d9   :  { %1599 = vtanh.f32 %v1387_v54  ;;  %v1409_v8 = vadd.f32 %v1407_v6, %v1399_v4 }
0x14db   :  { %1601 = vtanh.f32 %v1409_v8 }
0x14e6   :  { %v1600_v10 = vpop.eup %1599 }
0x14e7   :  { %1390 = vrot.lane.b32.xlu0 %v1600_v10, %s1651_s3 }
0x14e8   :  { %v1602_v11 = vpop.eup %1601 }
0x14e9   :  { %1412 = vrot.lane.b32.xlu1 %v1602_v11, %s1651_s3 }
0x1559   :  { %v1391_v12 = vpop.permute.xlu0 %1390 }
0x155a   :  { %v1393_v13 = vmul.f32 %v1391_v12, %v1375_v9 }
0x155b   :  { %v1413_v15 = vpop.permute.xlu1 %1412 }
0x155c   :  { %1417 = vrot.lane.b32.xlu0 %v1393_v13, %s1652_s19  ;;  %v1415_v16 = vmul.f32 %v1413_v15, %v1397_v49 }
0x155e   :  { %1421 = vrot.lane.b32.xlu1 %v1415_v16, %s1651_s3 }
0x15ce   :  { %v1418_v17 = vpop.permute.xlu0 %1417 }
0x15d0   :  { %v1422_v18 = vpop.permute.xlu1 %1421 }
0x15d1   :  { %v1424_v20 = vsel %vm363_vm1, %v1418_v17, %v1422_v18 }
0x15d2   :  { %1426 = vst.msk [vmem:[#allocation3 + $0x38] sm:$0xff] %vm226_vm2, %v1424_v20 }
0x15d9   :  { %v1428_v22 = vld [vmem:[#allocation3 + $0x38] sm:$0xff] }
0x15da   :  { %v1429_v23 = vsel %vm363_vm1, %v1427_v21, %v1428_v22  ;;  %v1457_v50 = vsel %vm363_vm1, %v1428_v22, %v1427_v21 }
0x15db   :  { %1430 = vst.msk [vmem:[#allocation7] sm:$0xff] %vm226_vm2, %v1429_v23  ;;  %1458 = vst.msk [vmem:[#allocation7 + $0x38] sm:$0xff] %vm226_vm2, %v1457_v50 }
0x15dc   :  { %1634 = shalt.err (!%p1631_p9)
}
0x15dd   :  { %s1654_s23 = smov 128   ;;  %s1655_s24 = smov 8  }
0x15de   :  { %1470 = dma.vmem_to_hbm [thread:$0]  %s1465_s21, 1024, %s2062_s4, [#allocation6], %s1654_s23, %s1654_s23, %s1655_s24  }
0x15df   :  { %1645 = dma.done.wait [#allocation6], 1024  }
0x15e0   :  { %1646 = vsyncadd [#allocation6], 4294966272 }
0x15e1   :  { %1474 = vsyncpa [#allocation5], 1 }
0x15e2   :  { %1475 = vsyncpa [#allocation6], 1 }

</bundles_post_ra>
